<compile_context>
chip_gen: v7x
topology: tpu7x:2x2x1
jax: 0.10.0
libtpu: 0.0.40
codegen_flags: <defaults>
</compile_context>

<pallas_src>
import math
import functools

import jax
import jax.numpy as jnp
from jax import lax
from jax.experimental import pallas as pl
from jax.experimental.pallas import tpu as pltpu

# ---------------- config (mirrors GNNBase args) ----------------
BATCH = 2
NUM_NODES = 8
NODE_OBS_DIM = 7          # node_obs = [node_feats(6), entity_type(1)]
NUM_EMBEDDINGS = 3
EMBEDDING_SIZE = 4
EMBED_HIDDEN = 32
EMBED_LAYER_N = 1
GNN_HIDDEN = 32
GNN_HEADS = 2
GNN_CONCAT = True
GNN_LAYER_N = 1
EDGE_DIM = 1
LN_EPS = 1e-5


# ---------------- fused GNNBase forward kernel ----------------
def fused_gnn_kernel(agent_ref,                        # scalar prefetch (SMEM): (B,) int32
                     pre_in_ref,                       # (B*N, N*Din + N): [rep node feats | adj row]
                     adj_big_ref,                      # (B*N, B*N) block-diag adjacency [dst, src]
                     mask_lanes_ref,                   # (B*N, N*He) 0/1 edge mask expanded to lanes
                     w_pre_ref, b1w_ref,               # EmbedConv lin1 (block-diag) + tiled bias
                     lng_ref, lnb_ref, m_mean_ref,     # tiled LN params + group-mean matrix
                     w2_ref, b2_ref,                   # EmbedConv hidden layers (block-diag)
                     s_pool_ref,                       # (N*He, He) src-group pooling matrix
                     hmask_ref,                        # (heads, HC) per-head lane masks
                     wqkvs1_ref, bqkvs1_ref, we1_ref,  # gnn1 fused [q|k|v|skip] + edge weight
                     wqkvs2_ref, bqkvs2_ref, we2_ref,  # gnn2 layers, stacked on dim 0
                     out_ref, *, B, N, heads, ch):
    f32 = jnp.float32
    BN = B * N
    HC = heads * ch
    scale = 1.0 / math.sqrt(ch)

    adj_big = adj_big_ref[...]                         # (BN, BN); adj_big[d, s] = adj[b, s, d]
    mask_big = adj_big != 0.0
    lng = lng_ref[...]
    lnb = lnb_ref[...]
    m_mean = m_mean_ref[...]                           # block-diag ones(He,He)/He

    def group_ln(h):
        # per-src-group (32-lane) LayerNorm, done lane-dense via the group-mean matmul
        mu = jnp.dot(h, m_mean, preferred_element_type=f32)
        d = h - mu
        var = jnp.dot(d * d, m_mean, preferred_element_type=f32)
        return d * lax.rsqrt(var + LN_EPS) * lng + lnb

    # ---- EmbedConv: per-edge MLP in (rows=(b,dst), lanes=src*He+c) layout ----
    h = jnp.dot(pre_in_ref[...], w_pre_ref[...], preferred_element_type=f32) + b1w_ref[...]
    h = group_ln(jnp.maximum(h, 0.0))
    for l in range(w2_ref.shape[0]):                   # embed_layer_N hidden layers
        h = jnp.dot(h, w2_ref[l], preferred_element_type=f32) + b2_ref[l]
        h = group_ln(jnp.maximum(h, 0.0))
    # masked add-aggregation over sources: one elementwise mask + one pooling matmul
    x = jnp.dot(h * mask_lanes_ref[...], s_pool_ref[...],
                preferred_element_type=f32)            # (BN, He)

    # ---- TransformerConv (dense masked multi-head attention on the big graph) ----
    hmask = hmask_ref[...]                             # (heads, HC)

    def tconv(xin, w_all, b_all, we_row):
        # one lane-dense fused projection: [q | k | v | skip]
        proj = jnp.dot(xin, w_all, preferred_element_type=f32) + b_all     # (BN, 4*HC)
        q_all = proj[:, 0 * HC:1 * HC]
        k_all = proj[:, 1 * HC:2 * HC]
        v_all = proj[:, 2 * HC:3 * HC]
        acc = proj[:, 3 * HC:4 * HC]                   # skip connection
        for hh in range(heads):                        # heads=2, statically unrolled
            hm = hmask[hh:hh + 1, :]                   # (1, HC) 0/1 lane mask for this head
            qh = q_all * hm
            kh = k_all * hm
            # scores[d, s] = q_h[d] . k_h[s]   (src on lanes)
            scores = lax.dot_general(qh, kh, (((1,), (1,)), ((), ())),
                                     preferred_element_type=f32)           # (BN, BN)
            wem = we_row * hm                          # edge weight, head lanes only
            qe = jnp.sum(q_all * wem, axis=1, keepdims=True)               # q_h . we_h  (BN, 1)
            logits = (scores + adj_big * qe) * scale
            logits = jnp.where(mask_big, logits, -1e30)
            m = jnp.max(logits, axis=1, keepdims=True)                     # lane reductions
            ex = jnp.where(mask_big, jnp.exp(logits - m), 0.0)             # keep masked zeros!
            den = jnp.sum(ex, axis=1, keepdims=True)
            # NOTE: exact divide kept (approx reciprocal risks the 2e-4 check)
            alpha = ex / jnp.where(den > 0.0, den, 1.0)                    # (BN, BN)
            ce = jnp.sum(alpha * adj_big, axis=1, keepdims=True)           # sum_s alpha*edge
            acc = acc + jnp.dot(alpha, v_all, preferred_element_type=f32) * hm + ce * wem
        return jnp.maximum(acc, 0.0)                   # gnn ReLU activation

    x = tconv(x, wqkvs1_ref[...], bqkvs1_ref[...], we1_ref[...])
    for l in range(wqkvs2_ref.shape[0]):
        x = tconv(x, wqkvs2_ref[l], bqkvs2_ref[l], we2_ref[l])

    # ---- graph_aggr == 'node': agent-row pull via a one-hot selection matmul ----
    row_ids = lax.broadcasted_iota(jnp.int32, (B, BN), 1)
    b_ids = lax.broadcasted_iota(jnp.int32, (B, BN), 0)
    sel = jnp.zeros((B, BN), f32)
    for b in range(B):
        a = jnp.clip(agent_ref[b], 0, N - 1)           # clamp: no OOB reads possible
        hit = jnp.logical_and(b_ids == b, row_ids == b * N + a)
        sel = jnp.where(hit, 1.0, sel)
    out_ref[...] = jnp.dot(sel, x, preferred_element_type=f32)


# ---------------- GNNBase forward (single fused Pallas call) ----------------
def _fuse_tconv(p):
    w = jnp.concatenate([p["wq"], p["wk"], p["wv"], p["ws"]], axis=1)
    b = jnp.concatenate([p["bq"], p["bk"], p["bv"], p["bs"]], axis=1)
    return w, b


def gnn_base_forward(params, node_obs, adj, agent_id):
    B, N, Dobs = node_obs.shape
    feat_dim = Dobs - 1
    He = EMBED_HIDDEN
    ch = GNN_HIDDEN
    heads = GNN_HEADS
    HC = heads * ch
    BN = B * N
    n_emb = NUM_EMBEDDINGS
    Din = feat_dim + n_emb
    f32 = jnp.float32
    eyeN = jnp.eye(N, dtype=f32)

    pe = params["embed"]
    # fold entity-embedding lookup into lin1: EMB(ent) @ w1n_emb == onehot @ (E @ w1n_emb)
    w_feat = pe["w1n"][:feat_dim, :]
    w_ent = jnp.dot(params["embed_table"], pe["w1n"][feat_dim:, :])
    w1_full = jnp.concatenate([w_feat, w_ent], axis=0)                  # (Din, He)

    # block-diagonal weights / constants for the src-on-lanes EmbedConv layout
    w_pre = jnp.concatenate([jnp.kron(eyeN, w1_full),
                             jnp.kron(eyeN, pe["w1e"])], axis=0)        # (N*Din + N, N*He)
    b1w = jnp.tile(pe["b1"], (1, N))
    lng_w = jnp.tile(pe["ln_g"], (1, N))
    lnb_w = jnp.tile(pe["ln_b"], (1, N))
    m_mean = jnp.kron(eyeN, jnp.ones((He, He), f32) / He)               # (N*He, N*He)
    w2_blk = jnp.stack([jnp.kron(eyeN, pe["w2"][l]) for l in range(EMBED_LAYER_N)])
    b2w = jnp.stack([jnp.tile(pe["b2"][l], (1, N)) for l in range(EMBED_LAYER_N)])
    s_pool = jnp.kron(jnp.ones((N, 1), f32), jnp.eye(He, dtype=f32))    # (N*He, He)
    hmask = jnp.kron(jnp.eye(heads, dtype=f32), jnp.ones((1, ch), f32))  # (heads, HC)

    # fused q|k|v|skip projections
    w1f, b1f = _fuse_tconv(params["gnn1"])
    w2f = jnp.stack([_fuse_tconv(p)[0] for p in params["gnn2"]])
    b2f = jnp.stack([_fuse_tconv(p)[1] for p in params["gnn2"]])
    we2 = jnp.stack([p["we"] for p in params["gnn2"]])

    # host-side input layout plumbing (process_adj analog + lane-dense input slabs)
    adj_t = jnp.transpose(adj, (0, 2, 1))                               # (B, dst, src)
    adj_flat = adj_t.reshape(BN, N)
    feat = node_obs[:, :, :feat_dim]
    ent = node_obs[:, :, feat_dim].astype(jnp.int32)
    onehot = (ent[:, :, None] == jnp.arange(n_emb)[None, None, :]).astype(f32)
    obs_aug = jnp.concatenate([feat, onehot], axis=-1)                  # (B, N, Din)
    obs_rep = jnp.repeat(obs_aug.reshape(B, N * Din), N, axis=0)        # (BN, N*Din)
    pre_in = jnp.concatenate([obs_rep, adj_flat], axis=1)               # (BN, N*Din + N)
    mask_lanes = jnp.repeat((adj_t != 0.0).astype(f32), He, axis=2).reshape(BN, N * He)
    adj_big = (adj_t[:, :, None, :]
               * jnp.eye(B, dtype=f32)[:, None, :, None]).reshape(BN, BN)
    agent = agent_id.reshape(B).astype(jnp.int32)

    def full(arr):
        nd = arr.ndim
        return pl.BlockSpec(arr.shape, lambda g, a, nd=nd: (0,) * nd)

    ins = (pre_in, adj_big, mask_lanes,
           w_pre, b1w, lng_w, lnb_w, m_mean,
           w2_blk, b2w, s_pool, hmask,
           w1f, b1f, params["gnn1"]["we"],
           w2f, b2f, we2)

    grid_spec = pltpu.PrefetchScalarGridSpec(
        num_scalar_prefetch=1,
        grid=(1,),                                     # single step: whole batch in one shot
        in_specs=[full(a) for a in ins],
        out_specs=pl.BlockSpec((B, HC), lambda g, a: (0, 0)),
    )
    kern = functools.partial(fused_gnn_kernel, B=B, N=N, heads=heads, ch=ch)
    return pl.pallas_call(
        kern,
        out_shape=jax.ShapeDtypeStruct((B, HC), jnp.float32),
        grid_spec=grid_spec,
        compiler_params=pltpu.CompilerParams(dimension_semantics=("arbitrary",)),
    )(agent, *ins)


# ---------------- pure-JAX reference (for correctness check) ----------------
def _layernorm_ref(x, g, b):
    mu = x.mean(axis=-1, keepdims=True)
    var = ((x - mu) ** 2).mean(axis=-1, keepdims=True)
    return (x - mu) / jnp.sqrt(var + LN_EPS) * g + b


def embed_conv_ref(node_in, adj, p):
    B, N, _ = node_in.shape
    outs = []
    for b in range(B):
        x, a = node_in[b], adj[b]
        pre = (x @ p["w1n"] + p["b1"])[:, None, :] \
            + a[:, :, None] * p["w1e"][0][None, None, :]
        h = _layernorm_ref(jnp.maximum(pre, 0.0), p["ln_g"][0], p["ln_b"][0])
        for l in range(p["w2"].shape[0]):
            h = jnp.einsum("sdh,hk->sdk", h, p["w2"][l]) + p["b2"][l][0]
            h = _layernorm_ref(jnp.maximum(h, 0.0), p["ln_g"][0], p["ln_b"][0])
        mask = (a != 0.0).astype(jnp.float32)
        outs.append(jnp.einsum("sd,sdh->dh", mask, h))
    return jnp.stack(outs)


def transformer_conv_ref(x_all, adj, p, heads, ch):
    B, N, _ = x_all.shape
    we3 = p["we"].reshape(heads, ch)
    outs = []
    for b in range(B):
        x, a = x_all[b], adj[b]
        q = (x @ p["wq"] + p["bq"]).reshape(N, heads, ch)
        k = (x @ p["wk"] + p["bk"]).reshape(N, heads, ch)
        v = (x @ p["wv"] + p["bv"]).reshape(N, heads, ch)
        e = a[:, :, None, None] * we3[None, None, :, :]
        ke = k[:, None, :, :] + e
        logits = jnp.einsum("dhc,sdhc->sdh", q, ke) / math.sqrt(ch)
        mask = (a != 0.0)[:, :, None]
        logits = jnp.where(mask, logits, -1e30)
        m = logits.max(axis=0, keepdims=True)
        ex = jnp.where(mask, jnp.exp(logits - m), 0.0)
        den = ex.sum(axis=0, keepdims=True)
        alpha = ex / jnp.where(den > 0, den, 1.0)
        out = jnp.einsum("sdh,sdhc->dhc", alpha, v[:, None, :, :] + e)
        out = out.reshape(N, heads * ch) + x @ p["ws"] + p["bs"]
        outs.append(jnp.maximum(out, 0.0))
    return jnp.stack(outs)


def gnn_base_forward_ref(params, node_obs, adj, agent_id):
    node_feat = node_obs[:, :, :-1]
    ent = node_obs[:, :, -1].astype(jnp.int32)
    emb = params["embed_table"][ent]
    node_in = jnp.concatenate([node_feat, emb], axis=-1)
    x = embed_conv_ref(node_in, adj, params["embed"])
    x = transformer_conv_ref(x, adj, params["gnn1"], GNN_HEADS, GNN_HIDDEN)
    for p in params["gnn2"]:
        x = transformer_conv_ref(x, adj, p, GNN_HEADS, GNN_HIDDEN)
    idx = agent_id.astype(jnp.int32)
    return jnp.take_along_axis(x, idx[:, :, None], axis=1)[:, 0, :]


# ---------------- deterministic parameter construction ----------------
def _lin(key, fan_in, fan_out):
    w = (1.0 / math.sqrt(fan_in)) * jax.random.normal(key, (fan_in, fan_out), jnp.float32)
    b = jnp.zeros((1, fan_out), jnp.float32)
    return w, b


def make_params(key):
    keys = jax.random.split(key, 32)
    ki = iter(keys)
    Dn = (NODE_OBS_DIM - 1) + EMBEDDING_SIZE
    He = EMBED_HIDDEN
    HC = GNN_HEADS * GNN_HIDDEN

    embed_table = 0.1 * jax.random.normal(next(ki), (NUM_EMBEDDINGS, EMBEDDING_SIZE), jnp.float32)

    w1n, b1 = _lin(next(ki), Dn, He)
    w1e = (1.0 / math.sqrt(Dn + EDGE_DIM)) * jax.random.normal(next(ki), (EDGE_DIM, He), jnp.float32)
    w2 = jnp.stack([_lin(next(ki), He, He)[0] for _ in range(EMBED_LAYER_N)])
    b2 = jnp.zeros((EMBED_LAYER_N, 1, He), jnp.float32)
    embed = dict(w1n=w1n, w1e=w1e, b1=b1, w2=w2, b2=b2,
                 ln_g=jnp.ones((1, He), jnp.float32), ln_b=jnp.zeros((1, He), jnp.float32))

    def tconv_params(fin):
        wq, bq = _lin(next(ki), fin, HC)
        wk, bk = _lin(next(ki), fin, HC)
        wv, bv = _lin(next(ki), fin, HC)
        we = jax.random.normal(next(ki), (1, HC), jnp.float32)
        ws, bs = _lin(next(ki), fin, HC)
        return dict(wq=wq, bq=bq, wk=wk, bk=bk, wv=wv, bv=bv, we=we, ws=ws, bs=bs)

    gnn1 = tconv_params(He)
    gnn2 = [tconv_params(HC) for _ in range(GNN_LAYER_N)]
    return dict(embed_table=embed_table, embed=embed, gnn1=gnn1, gnn2=gnn2)


if __name__ == "__main__":
    key = jax.random.PRNGKey(0)
    kp, kf, ke, ka = jax.random.split(key, 4)

    params = make_params(kp)

    feats = jax.random.normal(kf, (BATCH, NUM_NODES, NODE_OBS_DIM - 1), jnp.float32)
    ent = jax.random.randint(ke, (BATCH, NUM_NODES, 1), 0, NUM_EMBEDDINGS).astype(jnp.float32)
    node_obs = jnp.concatenate([feats, ent], axis=-1)          # (B, N, node_obs_dim)

    u = jax.random.uniform(ka, (BATCH, NUM_NODES, NUM_NODES), jnp.float32)
    adj = jnp.where(u < 0.45, 0.0, u)                          # distance-like adjacency, 0 = no edge
    agent_id = jnp.array([[0], [3]], jnp.int32)                # (B, 1)

    fwd = jax.jit(gnn_base_forward)
    out = jax.block_until_ready(fwd(params, node_obs, adj, agent_id))

    ref = jax.block_until_ready(gnn_base_forward_ref(params, node_obs, adj, agent_id))
    assert out.shape == (BATCH, GNN_HEADS * GNN_HIDDEN)
    assert bool(jnp.all(jnp.isfinite(out)))
    assert bool(jnp.allclose(out, ref, atol=2e-4, rtol=2e-4)), "mismatch vs pure-JAX reference"

    print("KERNEL_OK")
</pallas_src>

<mosaic_0001>
module attributes {stable_mosaic.version = 11 : i64} {
  func.func @fused_gnn_kernel(%arg0: i32, %arg1: memref<2xi32, #tpu.memory_space<smem>>, %arg2: memref<16x80xf32, #tpu.memory_space<vmem>>, %arg3: memref<16x16xf32, #tpu.memory_space<vmem>>, %arg4: memref<16x256xf32, #tpu.memory_space<vmem>>, %arg5: memref<80x256xf32, #tpu.memory_space<vmem>>, %arg6: memref<1x256xf32, #tpu.memory_space<vmem>>, %arg7: memref<1x256xf32, #tpu.memory_space<vmem>>, %arg8: memref<1x256xf32, #tpu.memory_space<vmem>>, %arg9: memref<256x256xf32, #tpu.memory_space<vmem>>, %arg10: memref<1x256x256xf32, #tpu.memory_space<vmem>>, %arg11: memref<1x1x256xf32, #tpu.memory_space<vmem>>, %arg12: memref<256x32xf32, #tpu.memory_space<vmem>>, %arg13: memref<2x64xf32, #tpu.memory_space<vmem>>, %arg14: memref<32x256xf32, #tpu.memory_space<vmem>>, %arg15: memref<1x256xf32, #tpu.memory_space<vmem>>, %arg16: memref<1x64xf32, #tpu.memory_space<vmem>>, %arg17: memref<1x64x256xf32, #tpu.memory_space<vmem>>, %arg18: memref<1x1x256xf32, #tpu.memory_space<vmem>>, %arg19: memref<1x1x64xf32, #tpu.memory_space<vmem>>, %arg20: memref<2x64xf32, #tpu.memory_space<vmem>>) attributes {dimension_semantics = [#tpu.dimension_semantics<arbitrary>], iteration_bounds = array<i64: 1>, scalar_prefetch = 1 : i64, scratch_operands = 0 : i64, tpu.core_type = #tpu.core_type<tc>, window_params = [{pipeline_mode = #tpu.pipeline_mode<synchronous>, transform_indices = @transform_0, window_bounds = array<i64: 16, 80>}, {pipeline_mode = #tpu.pipeline_mode<synchronous>, transform_indices = @transform_1, window_bounds = array<i64: 16, 16>}, {pipeline_mode = #tpu.pipeline_mode<synchronous>, transform_indices = @transform_2, window_bounds = array<i64: 16, 256>}, {pipeline_mode = #tpu.pipeline_mode<synchronous>, transform_indices = @transform_3, window_bounds = array<i64: 80, 256>}, {pipeline_mode = #tpu.pipeline_mode<synchronous>, transform_indices = @transform_4, window_bounds = array<i64: 1, 256>}, {pipeline_mode = #tpu.pipeline_mode<synchronous>, transform_indices = @transform_5, window_bounds = array<i64: 1, 256>}, {pipeline_mode = #tpu.pipeline_mode<synchronous>, transform_indices = @transform_6, window_bounds = array<i64: 1, 256>}, {pipeline_mode = #tpu.pipeline_mode<synchronous>, transform_indices = @transform_7, window_bounds = array<i64: 256, 256>}, {pipeline_mode = #tpu.pipeline_mode<synchronous>, transform_indices = @transform_8, window_bounds = array<i64: 1, 256, 256>}, {pipeline_mode = #tpu.pipeline_mode<synchronous>, transform_indices = @transform_9, window_bounds = array<i64: 1, 1, 256>}, {pipeline_mode = #tpu.pipeline_mode<synchronous>, transform_indices = @transform_10, window_bounds = array<i64: 256, 32>}, {pipeline_mode = #tpu.pipeline_mode<synchronous>, transform_indices = @transform_11, window_bounds = array<i64: 2, 64>}, {pipeline_mode = #tpu.pipeline_mode<synchronous>, transform_indices = @transform_12, window_bounds = array<i64: 32, 256>}, {pipeline_mode = #tpu.pipeline_mode<synchronous>, transform_indices = @transform_13, window_bounds = array<i64: 1, 256>}, {pipeline_mode = #tpu.pipeline_mode<synchronous>, transform_indices = @transform_14, window_bounds = array<i64: 1, 64>}, {pipeline_mode = #tpu.pipeline_mode<synchronous>, transform_indices = @transform_15, window_bounds = array<i64: 1, 64, 256>}, {pipeline_mode = #tpu.pipeline_mode<synchronous>, transform_indices = @transform_16, window_bounds = array<i64: 1, 1, 256>}, {pipeline_mode = #tpu.pipeline_mode<synchronous>, transform_indices = @transform_17, window_bounds = array<i64: 1, 1, 64>}, {pipeline_mode = #tpu.pipeline_mode<synchronous>, transform_indices = @transform_18, window_bounds = array<i64: 2, 64>}]} {
    %c0 = arith.constant 0 : index
    %c0_0 = arith.constant 0 : index
    %0 = vector.load %arg3[%c0, %c0_0] : memref<16x16xf32, #tpu.memory_space<vmem>>, vector<16x16xf32>
    %cst = arith.constant 0.000000e+00 : f32
    %1 = vector.broadcast %cst : f32 to vector<16x16xf32>
    %2 = arith.cmpf one, %0, %1 : vector<16x16xf32>
    %c0_1 = arith.constant 0 : index
    %c0_2 = arith.constant 0 : index
    %3 = vector.load %arg7[%c0_1, %c0_2] : memref<1x256xf32, #tpu.memory_space<vmem>>, vector<1x256xf32>
    %c0_3 = arith.constant 0 : index
    %c0_4 = arith.constant 0 : index
    %4 = vector.load %arg8[%c0_3, %c0_4] : memref<1x256xf32, #tpu.memory_space<vmem>>, vector<1x256xf32>
    %c0_5 = arith.constant 0 : index
    %c0_6 = arith.constant 0 : index
    %5 = vector.load %arg9[%c0_5, %c0_6] : memref<256x256xf32, #tpu.memory_space<vmem>>, vector<256x256xf32>
    %c0_7 = arith.constant 0 : index
    %c0_8 = arith.constant 0 : index
    %6 = vector.load %arg2[%c0_7, %c0_8] : memref<16x80xf32, #tpu.memory_space<vmem>>, vector<16x80xf32>
    %c0_9 = arith.constant 0 : index
    %c0_10 = arith.constant 0 : index
    %7 = vector.load %arg5[%c0_9, %c0_10] : memref<80x256xf32, #tpu.memory_space<vmem>>, vector<80x256xf32>
    %cst_11 = arith.constant dense<0.000000e+00> : vector<16x256xf32>
    %8 = tpu.matmul %6, %7, %cst_11 {dimension_numbers = #tpu.dot_dimension_numbers<[1], [0], [0], [1], [0, 0, 1, 1], [], []>} : vector<16x80xf32>, vector<80x256xf32>, vector<16x256xf32> -> vector<16x256xf32>
    %c0_12 = arith.constant 0 : index
    %c0_13 = arith.constant 0 : index
    %9 = vector.load %arg6[%c0_12, %c0_13] : memref<1x256xf32, #tpu.memory_space<vmem>>, vector<1x256xf32>
    %10 = vector.broadcast %9 : vector<1x256xf32> to vector<16x256xf32>
    %11 = arith.addf %8, %10 : vector<16x256xf32>
    %cst_14 = arith.constant 0.000000e+00 : f32
    %12 = vector.broadcast %cst_14 : f32 to vector<16x256xf32>
    %13 = arith.maximumf %11, %12 : vector<16x256xf32>
    %cst_15 = arith.constant dense<0.000000e+00> : vector<16x256xf32>
    %14 = tpu.matmul %13, %5, %cst_15 {dimension_numbers = #tpu.dot_dimension_numbers<[1], [0], [0], [1], [0, 0, 1, 1], [], []>} : vector<16x256xf32>, vector<256x256xf32>, vector<16x256xf32> -> vector<16x256xf32>
    %15 = arith.subf %13, %14 : vector<16x256xf32>
    %16 = arith.mulf %15, %15 : vector<16x256xf32>
    %cst_16 = arith.constant dense<0.000000e+00> : vector<16x256xf32>
    %17 = tpu.matmul %16, %5, %cst_16 {dimension_numbers = #tpu.dot_dimension_numbers<[1], [0], [0], [1], [0, 0, 1, 1], [], []>} : vector<16x256xf32>, vector<256x256xf32>, vector<16x256xf32> -> vector<16x256xf32>
    %cst_17 = arith.constant 9.99999974E-6 : f32
    %18 = vector.broadcast %cst_17 : f32 to vector<16x256xf32>
    %19 = arith.addf %17, %18 : vector<16x256xf32>
    %20 = math.rsqrt %19 : vector<16x256xf32>
    %21 = arith.mulf %15, %20 : vector<16x256xf32>
    %22 = vector.broadcast %3 : vector<1x256xf32> to vector<16x256xf32>
    %23 = arith.mulf %21, %22 : vector<16x256xf32>
    %24 = vector.broadcast %4 : vector<1x256xf32> to vector<16x256xf32>
    %25 = arith.addf %23, %24 : vector<16x256xf32>
    %c0_18 = arith.constant 0 : index
    %c0_19 = arith.constant 0 : index
    %c0_20 = arith.constant 0 : index
    %26 = vector.load %arg10[%c0_18, %c0_19, %c0_20] : memref<1x256x256xf32, #tpu.memory_space<vmem>>, vector<1x256x256xf32>
    %27 = vector.shape_cast %26 : vector<1x256x256xf32> to vector<256x256xf32>
    %cst_21 = arith.constant dense<0.000000e+00> : vector<16x256xf32>
    %28 = tpu.matmul %25, %27, %cst_21 {dimension_numbers = #tpu.dot_dimension_numbers<[1], [0], [0], [1], [0, 0, 1, 1], [], []>} : vector<16x256xf32>, vector<256x256xf32>, vector<16x256xf32> -> vector<16x256xf32>
    %c0_22 = arith.constant 0 : index
    %c0_23 = arith.constant 0 : index
    %c0_24 = arith.constant 0 : index
    %29 = vector.load %arg11[%c0_22, %c0_23, %c0_24] : memref<1x1x256xf32, #tpu.memory_space<vmem>>, vector<1x1x256xf32>
    %30 = vector.shape_cast %29 : vector<1x1x256xf32> to vector<1x256xf32>
    %31 = vector.broadcast %30 : vector<1x256xf32> to vector<16x256xf32>
    %32 = arith.addf %28, %31 : vector<16x256xf32>
    %cst_25 = arith.constant 0.000000e+00 : f32
    %33 = vector.broadcast %cst_25 : f32 to vector<16x256xf32>
    %34 = arith.maximumf %32, %33 : vector<16x256xf32>
    %cst_26 = arith.constant dense<0.000000e+00> : vector<16x256xf32>
    %35 = tpu.matmul %34, %5, %cst_26 {dimension_numbers = #tpu.dot_dimension_numbers<[1], [0], [0], [1], [0, 0, 1, 1], [], []>} : vector<16x256xf32>, vector<256x256xf32>, vector<16x256xf32> -> vector<16x256xf32>
    %36 = arith.subf %34, %35 : vector<16x256xf32>
    %37 = arith.mulf %36, %36 : vector<16x256xf32>
    %cst_27 = arith.constant dense<0.000000e+00> : vector<16x256xf32>
    %38 = tpu.matmul %37, %5, %cst_27 {dimension_numbers = #tpu.dot_dimension_numbers<[1], [0], [0], [1], [0, 0, 1, 1], [], []>} : vector<16x256xf32>, vector<256x256xf32>, vector<16x256xf32> -> vector<16x256xf32>
    %cst_28 = arith.constant 9.99999974E-6 : f32
    %39 = vector.broadcast %cst_28 : f32 to vector<16x256xf32>
    %40 = arith.addf %38, %39 : vector<16x256xf32>
    %41 = math.rsqrt %40 : vector<16x256xf32>
    %42 = arith.mulf %36, %41 : vector<16x256xf32>
    %43 = vector.broadcast %3 : vector<1x256xf32> to vector<16x256xf32>
    %44 = arith.mulf %42, %43 : vector<16x256xf32>
    %45 = vector.broadcast %4 : vector<1x256xf32> to vector<16x256xf32>
    %46 = arith.addf %44, %45 : vector<16x256xf32>
    %c0_29 = arith.constant 0 : index
    %c0_30 = arith.constant 0 : index
    %47 = vector.load %arg4[%c0_29, %c0_30] : memref<16x256xf32, #tpu.memory_space<vmem>>, vector<16x256xf32>
    %48 = arith.mulf %46, %47 : vector<16x256xf32>
    %c0_31 = arith.constant 0 : index
    %c0_32 = arith.constant 0 : index
    %49 = vector.load %arg12[%c0_31, %c0_32] : memref<256x32xf32, #tpu.memory_space<vmem>>, vector<256x32xf32>
    %cst_33 = arith.constant dense<0.000000e+00> : vector<16x32xf32>
    %50 = tpu.matmul %48, %49, %cst_33 {dimension_numbers = #tpu.dot_dimension_numbers<[1], [0], [0], [1], [0, 0, 1, 1], [], []>} : vector<16x256xf32>, vector<256x32xf32>, vector<16x32xf32> -> vector<16x32xf32>
    %c0_34 = arith.constant 0 : index
    %c0_35 = arith.constant 0 : index
    %51 = vector.load %arg13[%c0_34, %c0_35] : memref<2x64xf32, #tpu.memory_space<vmem>>, vector<2x64xf32>
    %c0_36 = arith.constant 0 : index
    %c0_37 = arith.constant 0 : index
    %52 = vector.load %arg14[%c0_36, %c0_37] : memref<32x256xf32, #tpu.memory_space<vmem>>, vector<32x256xf32>
    %c0_38 = arith.constant 0 : index
    %c0_39 = arith.constant 0 : index
    %53 = vector.load %arg15[%c0_38, %c0_39] : memref<1x256xf32, #tpu.memory_space<vmem>>, vector<1x256xf32>
    %c0_40 = arith.constant 0 : index
    %c0_41 = arith.constant 0 : index
    %54 = vector.load %arg16[%c0_40, %c0_41] : memref<1x64xf32, #tpu.memory_space<vmem>>, vector<1x64xf32>
    %cst_42 = arith.constant dense<0.000000e+00> : vector<16x256xf32>
    %55 = tpu.matmul %50, %52, %cst_42 {dimension_numbers = #tpu.dot_dimension_numbers<[1], [0], [0], [1], [0, 0, 1, 1], [], []>} : vector<16x32xf32>, vector<32x256xf32>, vector<16x256xf32> -> vector<16x256xf32>
    %56 = vector.broadcast %53 : vector<1x256xf32> to vector<16x256xf32>
    %57 = arith.addf %55, %56 : vector<16x256xf32>
    %58 = vector.extract_strided_slice %57 {offsets = [0, 0], sizes = [16, 64], strides = [1, 1]} : vector<16x256xf32> to vector<16x64xf32>
    %59 = vector.extract_strided_slice %57 {offsets = [0, 64], sizes = [16, 64], strides = [1, 1]} : vector<16x256xf32> to vector<16x64xf32>
    %60 = vector.extract_strided_slice %57 {offsets = [0, 128], sizes = [16, 64], strides = [1, 1]} : vector<16x256xf32> to vector<16x64xf32>
    %61 = vector.extract_strided_slice %57 {offsets = [0, 192], sizes = [16, 64], strides = [1, 1]} : vector<16x256xf32> to vector<16x64xf32>
    %62 = vector.extract_strided_slice %51 {offsets = [0, 0], sizes = [1, 64], strides = [1, 1]} : vector<2x64xf32> to vector<1x64xf32>
    %63 = vector.broadcast %62 : vector<1x64xf32> to vector<16x64xf32>
    %64 = arith.mulf %58, %63 : vector<16x64xf32>
    %65 = vector.broadcast %62 : vector<1x64xf32> to vector<16x64xf32>
    %66 = arith.mulf %59, %65 : vector<16x64xf32>
    %cst_43 = arith.constant dense<0.000000e+00> : vector<16x16xf32>
    %67 = tpu.matmul %64, %66, %cst_43 {dimension_numbers = #tpu.dot_dimension_numbers<[1], [1], [0], [0], [0, 0, 1, 0], [], []>} : vector<16x64xf32>, vector<16x64xf32>, vector<16x16xf32> -> vector<16x16xf32>
    %68 = arith.mulf %54, %62 : vector<1x64xf32>
    %69 = vector.broadcast %68 : vector<1x64xf32> to vector<16x64xf32>
    %70 = arith.mulf %58, %69 : vector<16x64xf32>
    %cst_44 = arith.constant dense<0.000000e+00> : vector<16xf32>
    %71 = vector.multi_reduction <add>, %70, %cst_44 [1] : vector<16x64xf32> to vector<16xf32>
    %72 = vector.shape_cast %71 : vector<16xf32> to vector<16x1xf32>
    %73 = vector.broadcast %72 : vector<16x1xf32> to vector<16x16xf32>
    %74 = arith.mulf %0, %73 : vector<16x16xf32>
    %75 = arith.addf %67, %74 : vector<16x16xf32>
    %cst_45 = arith.constant 0.176776692 : f32
    %76 = vector.broadcast %cst_45 : f32 to vector<16x16xf32>
    %77 = arith.mulf %75, %76 : vector<16x16xf32>
    %cst_46 = arith.constant -1.000000e+30 : f32
    %78 = vector.broadcast %cst_46 : f32 to vector<16x16xf32>
    %79 = arith.select %2, %77, %78 : vector<16x16xi1>, vector<16x16xf32>
    %cst_47 = arith.constant dense<0xFF800000> : vector<16xf32>
    %80 = vector.multi_reduction <maximumf>, %79, %cst_47 [1] : vector<16x16xf32> to vector<16xf32>
    %81 = vector.shape_cast %80 : vector<16xf32> to vector<16x1xf32>
    %82 = vector.broadcast %81 : vector<16x1xf32> to vector<16x16xf32>
    %83 = arith.subf %79, %82 : vector<16x16xf32>
    %84 = math.exp %83 : vector<16x16xf32>
    %cst_48 = arith.constant 0.000000e+00 : f32
    %85 = vector.broadcast %cst_48 : f32 to vector<16x16xf32>
    %86 = arith.select %2, %84, %85 : vector<16x16xi1>, vector<16x16xf32>
    %cst_49 = arith.constant dense<0.000000e+00> : vector<16xf32>
    %87 = vector.multi_reduction <add>, %86, %cst_49 [1] : vector<16x16xf32> to vector<16xf32>
    %88 = vector.shape_cast %87 : vector<16xf32> to vector<16x1xf32>
    %cst_50 = arith.constant 0.000000e+00 : f32
    %89 = vector.broadcast %cst_50 : f32 to vector<16x1xf32>
    %90 = arith.cmpf ogt, %88, %89 : vector<16x1xf32>
    %cst_51 = arith.constant 1.000000e+00 : f32
    %91 = vector.broadcast %cst_51 : f32 to vector<16x1xf32>
    %92 = arith.select %90, %88, %91 : vector<16x1xi1>, vector<16x1xf32>
    %93 = vector.broadcast %92 : vector<16x1xf32> to vector<16x16xf32>
    %94 = arith.divf %86, %93 : vector<16x16xf32>
    %95 = arith.mulf %94, %0 : vector<16x16xf32>
    %cst_52 = arith.constant dense<0.000000e+00> : vector<16xf32>
    %96 = vector.multi_reduction <add>, %95, %cst_52 [1] : vector<16x16xf32> to vector<16xf32>
    %97 = vector.shape_cast %96 : vector<16xf32> to vector<16x1xf32>
    %cst_53 = arith.constant dense<0.000000e+00> : vector<16x64xf32>
    %98 = tpu.matmul %94, %60, %cst_53 {dimension_numbers = #tpu.dot_dimension_numbers<[1], [0], [0], [1], [0, 0, 1, 1], [], []>} : vector<16x16xf32>, vector<16x64xf32>, vector<16x64xf32> -> vector<16x64xf32>
    %99 = vector.broadcast %62 : vector<1x64xf32> to vector<16x64xf32>
    %100 = arith.mulf %98, %99 : vector<16x64xf32>
    %101 = arith.addf %61, %100 : vector<16x64xf32>
    %102 = vector.broadcast %97 : vector<16x1xf32> to vector<16x64xf32>
    %103 = vector.broadcast %68 : vector<1x64xf32> to vector<16x64xf32>
    %104 = arith.mulf %102, %103 : vector<16x64xf32>
    %105 = arith.addf %101, %104 : vector<16x64xf32>
    %106 = vector.extract_strided_slice %51 {offsets = [1, 0], sizes = [1, 64], strides = [1, 1]} : vector<2x64xf32> to vector<1x64xf32>
    %107 = vector.broadcast %106 : vector<1x64xf32> to vector<16x64xf32>
    %108 = arith.mulf %58, %107 : vector<16x64xf32>
    %109 = vector.broadcast %106 : vector<1x64xf32> to vector<16x64xf32>
    %110 = arith.mulf %59, %109 : vector<16x64xf32>
    %cst_54 = arith.constant dense<0.000000e+00> : vector<16x16xf32>
    %111 = tpu.matmul %108, %110, %cst_54 {dimension_numbers = #tpu.dot_dimension_numbers<[1], [1], [0], [0], [0, 0, 1, 0], [], []>} : vector<16x64xf32>, vector<16x64xf32>, vector<16x16xf32> -> vector<16x16xf32>
    %112 = arith.mulf %54, %106 : vector<1x64xf32>
    %113 = vector.broadcast %112 : vector<1x64xf32> to vector<16x64xf32>
    %114 = arith.mulf %58, %113 : vector<16x64xf32>
    %cst_55 = arith.constant dense<0.000000e+00> : vector<16xf32>
    %115 = vector.multi_reduction <add>, %114, %cst_55 [1] : vector<16x64xf32> to vector<16xf32>
    %116 = vector.shape_cast %115 : vector<16xf32> to vector<16x1xf32>
    %117 = vector.broadcast %116 : vector<16x1xf32> to vector<16x16xf32>
    %118 = arith.mulf %0, %117 : vector<16x16xf32>
    %119 = arith.addf %111, %118 : vector<16x16xf32>
    %cst_56 = arith.constant 0.176776692 : f32
    %120 = vector.broadcast %cst_56 : f32 to vector<16x16xf32>
    %121 = arith.mulf %119, %120 : vector<16x16xf32>
    %cst_57 = arith.constant -1.000000e+30 : f32
    %122 = vector.broadcast %cst_57 : f32 to vector<16x16xf32>
    %123 = arith.select %2, %121, %122 : vector<16x16xi1>, vector<16x16xf32>
    %cst_58 = arith.constant dense<0xFF800000> : vector<16xf32>
    %124 = vector.multi_reduction <maximumf>, %123, %cst_58 [1] : vector<16x16xf32> to vector<16xf32>
    %125 = vector.shape_cast %124 : vector<16xf32> to vector<16x1xf32>
    %126 = vector.broadcast %125 : vector<16x1xf32> to vector<16x16xf32>
    %127 = arith.subf %123, %126 : vector<16x16xf32>
    %128 = math.exp %127 : vector<16x16xf32>
    %cst_59 = arith.constant 0.000000e+00 : f32
    %129 = vector.broadcast %cst_59 : f32 to vector<16x16xf32>
    %130 = arith.select %2, %128, %129 : vector<16x16xi1>, vector<16x16xf32>
    %cst_60 = arith.constant dense<0.000000e+00> : vector<16xf32>
    %131 = vector.multi_reduction <add>, %130, %cst_60 [1] : vector<16x16xf32> to vector<16xf32>
    %132 = vector.shape_cast %131 : vector<16xf32> to vector<16x1xf32>
    %cst_61 = arith.constant 0.000000e+00 : f32
    %133 = vector.broadcast %cst_61 : f32 to vector<16x1xf32>
    %134 = arith.cmpf ogt, %132, %133 : vector<16x1xf32>
    %cst_62 = arith.constant 1.000000e+00 : f32
    %135 = vector.broadcast %cst_62 : f32 to vector<16x1xf32>
    %136 = arith.select %134, %132, %135 : vector<16x1xi1>, vector<16x1xf32>
    %137 = vector.broadcast %136 : vector<16x1xf32> to vector<16x16xf32>
    %138 = arith.divf %130, %137 : vector<16x16xf32>
    %139 = arith.mulf %138, %0 : vector<16x16xf32>
    %cst_63 = arith.constant dense<0.000000e+00> : vector<16xf32>
    %140 = vector.multi_reduction <add>, %139, %cst_63 [1] : vector<16x16xf32> to vector<16xf32>
    %141 = vector.shape_cast %140 : vector<16xf32> to vector<16x1xf32>
    %cst_64 = arith.constant dense<0.000000e+00> : vector<16x64xf32>
    %142 = tpu.matmul %138, %60, %cst_64 {dimension_numbers = #tpu.dot_dimension_numbers<[1], [0], [0], [1], [0, 0, 1, 1], [], []>} : vector<16x16xf32>, vector<16x64xf32>, vector<16x64xf32> -> vector<16x64xf32>
    %143 = vector.broadcast %106 : vector<1x64xf32> to vector<16x64xf32>
    %144 = arith.mulf %142, %143 : vector<16x64xf32>
    %145 = arith.addf %105, %144 : vector<16x64xf32>
    %146 = vector.broadcast %141 : vector<16x1xf32> to vector<16x64xf32>
    %147 = vector.broadcast %112 : vector<1x64xf32> to vector<16x64xf32>
    %148 = arith.mulf %146, %147 : vector<16x64xf32>
    %149 = arith.addf %145, %148 : vector<16x64xf32>
    %cst_65 = arith.constant 0.000000e+00 : f32
    %150 = vector.broadcast %cst_65 : f32 to vector<16x64xf32>
    %151 = arith.maximumf %149, %150 : vector<16x64xf32>
    %c0_66 = arith.constant 0 : index
    %c0_67 = arith.constant 0 : index
    %c0_68 = arith.constant 0 : index
    %152 = vector.load %arg17[%c0_66, %c0_67, %c0_68] : memref<1x64x256xf32, #tpu.memory_space<vmem>>, vector<1x64x256xf32>
    %153 = vector.shape_cast %152 : vector<1x64x256xf32> to vector<64x256xf32>
    %c0_69 = arith.constant 0 : index
    %c0_70 = arith.constant 0 : index
    %c0_71 = arith.constant 0 : index
    %154 = vector.load %arg18[%c0_69, %c0_70, %c0_71] : memref<1x1x256xf32, #tpu.memory_space<vmem>>, vector<1x1x256xf32>
    %155 = vector.shape_cast %154 : vector<1x1x256xf32> to vector<1x256xf32>
    %c0_72 = arith.constant 0 : index
    %c0_73 = arith.constant 0 : index
    %c0_74 = arith.constant 0 : index
    %156 = vector.load %arg19[%c0_72, %c0_73, %c0_74] : memref<1x1x64xf32, #tpu.memory_space<vmem>>, vector<1x1x64xf32>
    %157 = vector.shape_cast %156 : vector<1x1x64xf32> to vector<1x64xf32>
    %cst_75 = arith.constant dense<0.000000e+00> : vector<16x256xf32>
    %158 = tpu.matmul %151, %153, %cst_75 {dimension_numbers = #tpu.dot_dimension_numbers<[1], [0], [0], [1], [0, 0, 1, 1], [], []>} : vector<16x64xf32>, vector<64x256xf32>, vector<16x256xf32> -> vector<16x256xf32>
    %159 = vector.broadcast %155 : vector<1x256xf32> to vector<16x256xf32>
    %160 = arith.addf %158, %159 : vector<16x256xf32>
    %161 = vector.extract_strided_slice %160 {offsets = [0, 0], sizes = [16, 64], strides = [1, 1]} : vector<16x256xf32> to vector<16x64xf32>
    %162 = vector.extract_strided_slice %160 {offsets = [0, 64], sizes = [16, 64], strides = [1, 1]} : vector<16x256xf32> to vector<16x64xf32>
    %163 = vector.extract_strided_slice %160 {offsets = [0, 128], sizes = [16, 64], strides = [1, 1]} : vector<16x256xf32> to vector<16x64xf32>
    %164 = vector.extract_strided_slice %160 {offsets = [0, 192], sizes = [16, 64], strides = [1, 1]} : vector<16x256xf32> to vector<16x64xf32>
    %165 = vector.extract_strided_slice %51 {offsets = [0, 0], sizes = [1, 64], strides = [1, 1]} : vector<2x64xf32> to vector<1x64xf32>
    %166 = vector.broadcast %165 : vector<1x64xf32> to vector<16x64xf32>
    %167 = arith.mulf %161, %166 : vector<16x64xf32>
    %168 = vector.broadcast %165 : vector<1x64xf32> to vector<16x64xf32>
    %169 = arith.mulf %162, %168 : vector<16x64xf32>
    %cst_76 = arith.constant dense<0.000000e+00> : vector<16x16xf32>
    %170 = tpu.matmul %167, %169, %cst_76 {dimension_numbers = #tpu.dot_dimension_numbers<[1], [1], [0], [0], [0, 0, 1, 0], [], []>} : vector<16x64xf32>, vector<16x64xf32>, vector<16x16xf32> -> vector<16x16xf32>
    %171 = arith.mulf %157, %165 : vector<1x64xf32>
    %172 = vector.broadcast %171 : vector<1x64xf32> to vector<16x64xf32>
    %173 = arith.mulf %161, %172 : vector<16x64xf32>
    %cst_77 = arith.constant dense<0.000000e+00> : vector<16xf32>
    %174 = vector.multi_reduction <add>, %173, %cst_77 [1] : vector<16x64xf32> to vector<16xf32>
    %175 = vector.shape_cast %174 : vector<16xf32> to vector<16x1xf32>
    %176 = vector.broadcast %175 : vector<16x1xf32> to vector<16x16xf32>
    %177 = arith.mulf %0, %176 : vector<16x16xf32>
    %178 = arith.addf %170, %177 : vector<16x16xf32>
    %cst_78 = arith.constant 0.176776692 : f32
    %179 = vector.broadcast %cst_78 : f32 to vector<16x16xf32>
    %180 = arith.mulf %178, %179 : vector<16x16xf32>
    %cst_79 = arith.constant -1.000000e+30 : f32
    %181 = vector.broadcast %cst_79 : f32 to vector<16x16xf32>
    %182 = arith.select %2, %180, %181 : vector<16x16xi1>, vector<16x16xf32>
    %cst_80 = arith.constant dense<0xFF800000> : vector<16xf32>
    %183 = vector.multi_reduction <maximumf>, %182, %cst_80 [1] : vector<16x16xf32> to vector<16xf32>
    %184 = vector.shape_cast %183 : vector<16xf32> to vector<16x1xf32>
    %185 = vector.broadcast %184 : vector<16x1xf32> to vector<16x16xf32>
    %186 = arith.subf %182, %185 : vector<16x16xf32>
    %187 = math.exp %186 : vector<16x16xf32>
    %cst_81 = arith.constant 0.000000e+00 : f32
    %188 = vector.broadcast %cst_81 : f32 to vector<16x16xf32>
    %189 = arith.select %2, %187, %188 : vector<16x16xi1>, vector<16x16xf32>
    %cst_82 = arith.constant dense<0.000000e+00> : vector<16xf32>
    %190 = vector.multi_reduction <add>, %189, %cst_82 [1] : vector<16x16xf32> to vector<16xf32>
    %191 = vector.shape_cast %190 : vector<16xf32> to vector<16x1xf32>
    %cst_83 = arith.constant 0.000000e+00 : f32
    %192 = vector.broadcast %cst_83 : f32 to vector<16x1xf32>
    %193 = arith.cmpf ogt, %191, %192 : vector<16x1xf32>
    %cst_84 = arith.constant 1.000000e+00 : f32
    %194 = vector.broadcast %cst_84 : f32 to vector<16x1xf32>
    %195 = arith.select %193, %191, %194 : vector<16x1xi1>, vector<16x1xf32>
    %196 = vector.broadcast %195 : vector<16x1xf32> to vector<16x16xf32>
    %197 = arith.divf %189, %196 : vector<16x16xf32>
    %198 = arith.mulf %197, %0 : vector<16x16xf32>
    %cst_85 = arith.constant dense<0.000000e+00> : vector<16xf32>
    %199 = vector.multi_reduction <add>, %198, %cst_85 [1] : vector<16x16xf32> to vector<16xf32>
    %200 = vector.shape_cast %199 : vector<16xf32> to vector<16x1xf32>
    %cst_86 = arith.constant dense<0.000000e+00> : vector<16x64xf32>
    %201 = tpu.matmul %197, %163, %cst_86 {dimension_numbers = #tpu.dot_dimension_numbers<[1], [0], [0], [1], [0, 0, 1, 1], [], []>} : vector<16x16xf32>, vector<16x64xf32>, vector<16x64xf32> -> vector<16x64xf32>
    %202 = vector.broadcast %165 : vector<1x64xf32> to vector<16x64xf32>
    %203 = arith.mulf %201, %202 : vector<16x64xf32>
    %204 = arith.addf %164, %203 : vector<16x64xf32>
    %205 = vector.broadcast %200 : vector<16x1xf32> to vector<16x64xf32>
    %206 = vector.broadcast %171 : vector<1x64xf32> to vector<16x64xf32>
    %207 = arith.mulf %205, %206 : vector<16x64xf32>
    %208 = arith.addf %204, %207 : vector<16x64xf32>
    %209 = vector.extract_strided_slice %51 {offsets = [1, 0], sizes = [1, 64], strides = [1, 1]} : vector<2x64xf32> to vector<1x64xf32>
    %210 = vector.broadcast %209 : vector<1x64xf32> to vector<16x64xf32>
    %211 = arith.mulf %161, %210 : vector<16x64xf32>
    %212 = vector.broadcast %209 : vector<1x64xf32> to vector<16x64xf32>
    %213 = arith.mulf %162, %212 : vector<16x64xf32>
    %cst_87 = arith.constant dense<0.000000e+00> : vector<16x16xf32>
    %214 = tpu.matmul %211, %213, %cst_87 {dimension_numbers = #tpu.dot_dimension_numbers<[1], [1], [0], [0], [0, 0, 1, 0], [], []>} : vector<16x64xf32>, vector<16x64xf32>, vector<16x16xf32> -> vector<16x16xf32>
    %215 = arith.mulf %157, %209 : vector<1x64xf32>
    %216 = vector.broadcast %215 : vector<1x64xf32> to vector<16x64xf32>
    %217 = arith.mulf %161, %216 : vector<16x64xf32>
    %cst_88 = arith.constant dense<0.000000e+00> : vector<16xf32>
    %218 = vector.multi_reduction <add>, %217, %cst_88 [1] : vector<16x64xf32> to vector<16xf32>
    %219 = vector.shape_cast %218 : vector<16xf32> to vector<16x1xf32>
    %220 = vector.broadcast %219 : vector<16x1xf32> to vector<16x16xf32>
    %221 = arith.mulf %0, %220 : vector<16x16xf32>
    %222 = arith.addf %214, %221 : vector<16x16xf32>
    %cst_89 = arith.constant 0.176776692 : f32
    %223 = vector.broadcast %cst_89 : f32 to vector<16x16xf32>
    %224 = arith.mulf %222, %223 : vector<16x16xf32>
    %cst_90 = arith.constant -1.000000e+30 : f32
    %225 = vector.broadcast %cst_90 : f32 to vector<16x16xf32>
    %226 = arith.select %2, %224, %225 : vector<16x16xi1>, vector<16x16xf32>
    %cst_91 = arith.constant dense<0xFF800000> : vector<16xf32>
    %227 = vector.multi_reduction <maximumf>, %226, %cst_91 [1] : vector<16x16xf32> to vector<16xf32>
    %228 = vector.shape_cast %227 : vector<16xf32> to vector<16x1xf32>
    %229 = vector.broadcast %228 : vector<16x1xf32> to vector<16x16xf32>
    %230 = arith.subf %226, %229 : vector<16x16xf32>
    %231 = math.exp %230 : vector<16x16xf32>
    %cst_92 = arith.constant 0.000000e+00 : f32
    %232 = vector.broadcast %cst_92 : f32 to vector<16x16xf32>
    %233 = arith.select %2, %231, %232 : vector<16x16xi1>, vector<16x16xf32>
    %cst_93 = arith.constant dense<0.000000e+00> : vector<16xf32>
    %234 = vector.multi_reduction <add>, %233, %cst_93 [1] : vector<16x16xf32> to vector<16xf32>
    %235 = vector.shape_cast %234 : vector<16xf32> to vector<16x1xf32>
    %cst_94 = arith.constant 0.000000e+00 : f32
    %236 = vector.broadcast %cst_94 : f32 to vector<16x1xf32>
    %237 = arith.cmpf ogt, %235, %236 : vector<16x1xf32>
    %cst_95 = arith.constant 1.000000e+00 : f32
    %238 = vector.broadcast %cst_95 : f32 to vector<16x1xf32>
    %239 = arith.select %237, %235, %238 : vector<16x1xi1>, vector<16x1xf32>
    %240 = vector.broadcast %239 : vector<16x1xf32> to vector<16x16xf32>
    %241 = arith.divf %233, %240 : vector<16x16xf32>
    %242 = arith.mulf %241, %0 : vector<16x16xf32>
    %cst_96 = arith.constant dense<0.000000e+00> : vector<16xf32>
    %243 = vector.multi_reduction <add>, %242, %cst_96 [1] : vector<16x16xf32> to vector<16xf32>
    %244 = vector.shape_cast %243 : vector<16xf32> to vector<16x1xf32>
    %cst_97 = arith.constant dense<0.000000e+00> : vector<16x64xf32>
    %245 = tpu.matmul %241, %163, %cst_97 {dimension_numbers = #tpu.dot_dimension_numbers<[1], [0], [0], [1], [0, 0, 1, 1], [], []>} : vector<16x16xf32>, vector<16x64xf32>, vector<16x64xf32> -> vector<16x64xf32>
    %246 = vector.broadcast %209 : vector<1x64xf32> to vector<16x64xf32>
    %247 = arith.mulf %245, %246 : vector<16x64xf32>
    %248 = arith.addf %208, %247 : vector<16x64xf32>
    %249 = vector.broadcast %244 : vector<16x1xf32> to vector<16x64xf32>
    %250 = vector.broadcast %215 : vector<1x64xf32> to vector<16x64xf32>
    %251 = arith.mulf %249, %250 : vector<16x64xf32>
    %252 = arith.addf %248, %251 : vector<16x64xf32>
    %cst_98 = arith.constant 0.000000e+00 : f32
    %253 = vector.broadcast %cst_98 : f32 to vector<16x64xf32>
    %254 = arith.maximumf %252, %253 : vector<16x64xf32>
    %255 = tpu.iota {dimensions = array<i32: 1>} : vector<2x16xi32>
    %256 = tpu.iota {dimensions = array<i32: 0>} : vector<2x16xi32>
    %cst_99 = arith.constant 0.000000e+00 : f32
    %257 = vector.broadcast %cst_99 : f32 to vector<2x16xf32>
    %c0_100 = arith.constant 0 : index
    %258 = memref.load %arg1[%c0_100] : memref<2xi32, #tpu.memory_space<smem>>
    %c0_i32 = arith.constant 0 : i32
    %c7_i32 = arith.constant 7 : i32
    %259 = arith.maxsi %c0_i32, %258 : i32
    %260 = arith.minsi %c7_i32, %259 : i32
    %c0_i32_101 = arith.constant 0 : i32
    %261 = vector.broadcast %c0_i32_101 : i32 to vector<2x16xi32>
    %262 = arith.cmpi eq, %256, %261 : vector<2x16xi32>
    %c0_i32_102 = arith.constant 0 : i32
    %263 = arith.addi %c0_i32_102, %260 : i32
    %264 = vector.broadcast %263 : i32 to vector<2x16xi32>
    %265 = arith.cmpi eq, %255, %264 : vector<2x16xi32>
    %266 = arith.andi %262, %265 : vector<2x16xi1>
    %cst_103 = arith.constant 1.000000e+00 : f32
    %267 = vector.broadcast %cst_103 : f32 to vector<2x16xf32>
    %268 = arith.select %266, %267, %257 : vector<2x16xi1>, vector<2x16xf32>
    %c1 = arith.constant 1 : index
    %269 = memref.load %arg1[%c1] : memref<2xi32, #tpu.memory_space<smem>>
    %c0_i32_104 = arith.constant 0 : i32
    %c7_i32_105 = arith.constant 7 : i32
    %270 = arith.maxsi %c0_i32_104, %269 : i32
    %271 = arith.minsi %c7_i32_105, %270 : i32
    %c1_i32 = arith.constant 1 : i32
    %272 = vector.broadcast %c1_i32 : i32 to vector<2x16xi32>
    %273 = arith.cmpi eq, %256, %272 : vector<2x16xi32>
    %c8_i32 = arith.constant 8 : i32
    %274 = arith.addi %c8_i32, %271 : i32
    %275 = vector.broadcast %274 : i32 to vector<2x16xi32>
    %276 = arith.cmpi eq, %255, %275 : vector<2x16xi32>
    %277 = arith.andi %273, %276 : vector<2x16xi1>
    %cst_106 = arith.constant 1.000000e+00 : f32
    %278 = vector.broadcast %cst_106 : f32 to vector<2x16xf32>
    %279 = arith.select %277, %278, %268 : vector<2x16xi1>, vector<2x16xf32>
    %cst_107 = arith.constant dense<0.000000e+00> : vector<2x64xf32>
    %280 = tpu.matmul %279, %254, %cst_107 {dimension_numbers = #tpu.dot_dimension_numbers<[1], [0], [0], [1], [0, 0, 1, 1], [], []>} : vector<2x16xf32>, vector<16x64xf32>, vector<2x64xf32> -> vector<2x64xf32>
    %c0_108 = arith.constant 0 : index
    %c0_109 = arith.constant 0 : index
    %281 = vector.load %arg20[%c0_108, %c0_109] : memref<2x64xf32, #tpu.memory_space<vmem>>, vector<2x64xf32>
    tpu.vector_store %arg20[%c0_108, %c0_109], %280 {strides = array<i32>} : memref<2x64xf32, #tpu.memory_space<vmem>>, vector<2x64xf32>,
    return
  }
  func.func @transform_0(%arg0: i32, %arg1: memref<2xi32, #tpu.memory_space<smem>>) -> (i32, i32) {
    %c0_i32 = arith.constant 0 : i32
    %c0_i32_0 = arith.constant 0 : i32
    %c0_i32_1 = arith.constant 0 : i32
    return %c0_i32, %c0_i32_0 : i32, i32
  }
  func.func @transform_1(%arg0: i32, %arg1: memref<2xi32, #tpu.memory_space<smem>>) -> (i32, i32) {
    %c0_i32 = arith.constant 0 : i32
    %c0_i32_0 = arith.constant 0 : i32
    %c0_i32_1 = arith.constant 0 : i32
    return %c0_i32, %c0_i32_0 : i32, i32
  }
  func.func @transform_2(%arg0: i32, %arg1: memref<2xi32, #tpu.memory_space<smem>>) -> (i32, i32) {
    %c0_i32 = arith.constant 0 : i32
    %c0_i32_0 = arith.constant 0 : i32
    %c0_i32_1 = arith.constant 0 : i32
    return %c0_i32, %c0_i32_0 : i32, i32
  }
  func.func @transform_3(%arg0: i32, %arg1: memref<2xi32, #tpu.memory_space<smem>>) -> (i32, i32) {
    %c0_i32 = arith.constant 0 : i32
    %c0_i32_0 = arith.constant 0 : i32
    %c0_i32_1 = arith.constant 0 : i32
    return %c0_i32, %c0_i32_0 : i32, i32
  }
  func.func @transform_4(%arg0: i32, %arg1: memref<2xi32, #tpu.memory_space<smem>>) -> (i32, i32) {
    %c0_i32 = arith.constant 0 : i32
    %c0_i32_0 = arith.constant 0 : i32
    %c0_i32_1 = arith.constant 0 : i32
    return %c0_i32, %c0_i32_0 : i32, i32
  }
  func.func @transform_5(%arg0: i32, %arg1: memref<2xi32, #tpu.memory_space<smem>>) -> (i32, i32) {
    %c0_i32 = arith.constant 0 : i32
    %c0_i32_0 = arith.constant 0 : i32
    %c0_i32_1 = arith.constant 0 : i32
    return %c0_i32, %c0_i32_0 : i32, i32
  }
  func.func @transform_6(%arg0: i32, %arg1: memref<2xi32, #tpu.memory_space<smem>>) -> (i32, i32) {
    %c0_i32 = arith.constant 0 : i32
    %c0_i32_0 = arith.constant 0 : i32
    %c0_i32_1 = arith.constant 0 : i32
    return %c0_i32, %c0_i32_0 : i32, i32
  }
  func.func @transform_7(%arg0: i32, %arg1: memref<2xi32, #tpu.memory_space<smem>>) -> (i32, i32) {
    %c0_i32 = arith.constant 0 : i32
    %c0_i32_0 = arith.constant 0 : i32
    %c0_i32_1 = arith.constant 0 : i32
    return %c0_i32, %c0_i32_0 : i32, i32
  }
  func.func @transform_8(%arg0: i32, %arg1: memref<2xi32, #tpu.memory_space<smem>>) -> (i32, i32, i32) {
    %c0_i32 = arith.constant 0 : i32
    %c0_i32_0 = arith.constant 0 : i32
    %c0_i32_1 = arith.constant 0 : i32
    %c0_i32_2 = arith.constant 0 : i32
    return %c0_i32, %c0_i32_0, %c0_i32_1 : i32, i32, i32
  }
  func.func @transform_9(%arg0: i32, %arg1: memref<2xi32, #tpu.memory_space<smem>>) -> (i32, i32, i32) {
    %c0_i32 = arith.constant 0 : i32
    %c0_i32_0 = arith.constant 0 : i32
    %c0_i32_1 = arith.constant 0 : i32
    %c0_i32_2 = arith.constant 0 : i32
    return %c0_i32, %c0_i32_0, %c0_i32_1 : i32, i32, i32
  }
  func.func @transform_10(%arg0: i32, %arg1: memref<2xi32, #tpu.memory_space<smem>>) -> (i32, i32) {
    %c0_i32 = arith.constant 0 : i32
    %c0_i32_0 = arith.constant 0 : i32
    %c0_i32_1 = arith.constant 0 : i32
    return %c0_i32, %c0_i32_0 : i32, i32
  }
  func.func @transform_11(%arg0: i32, %arg1: memref<2xi32, #tpu.memory_space<smem>>) -> (i32, i32) {
    %c0_i32 = arith.constant 0 : i32
    %c0_i32_0 = arith.constant 0 : i32
    %c0_i32_1 = arith.constant 0 : i32
    return %c0_i32, %c0_i32_0 : i32, i32
  }
  func.func @transform_12(%arg0: i32, %arg1: memref<2xi32, #tpu.memory_space<smem>>) -> (i32, i32) {
    %c0_i32 = arith.constant 0 : i32
    %c0_i32_0 = arith.constant 0 : i32
    %c0_i32_1 = arith.constant 0 : i32
    return %c0_i32, %c0_i32_0 : i32, i32
  }
  func.func @transform_13(%arg0: i32, %arg1: memref<2xi32, #tpu.memory_space<smem>>) -> (i32, i32) {
    %c0_i32 = arith.constant 0 : i32
    %c0_i32_0 = arith.constant 0 : i32
    %c0_i32_1 = arith.constant 0 : i32
    return %c0_i32, %c0_i32_0 : i32, i32
  }
  func.func @transform_14(%arg0: i32, %arg1: memref<2xi32, #tpu.memory_space<smem>>) -> (i32, i32) {
    %c0_i32 = arith.constant 0 : i32
    %c0_i32_0 = arith.constant 0 : i32
    %c0_i32_1 = arith.constant 0 : i32
    return %c0_i32, %c0_i32_0 : i32, i32
  }
  func.func @transform_15(%arg0: i32, %arg1: memref<2xi32, #tpu.memory_space<smem>>) -> (i32, i32, i32) {
    %c0_i32 = arith.constant 0 : i32
    %c0_i32_0 = arith.constant 0 : i32
    %c0_i32_1 = arith.constant 0 : i32
    %c0_i32_2 = arith.constant 0 : i32
    return %c0_i32, %c0_i32_0, %c0_i32_1 : i32, i32, i32
  }
  func.func @transform_16(%arg0: i32, %arg1: memref<2xi32, #tpu.memory_space<smem>>) -> (i32, i32, i32) {
    %c0_i32 = arith.constant 0 : i32
    %c0_i32_0 = arith.constant 0 : i32
    %c0_i32_1 = arith.constant 0 : i32
    %c0_i32_2 = arith.constant 0 : i32
    return %c0_i32, %c0_i32_0, %c0_i32_1 : i32, i32, i32
  }
  func.func @transform_17(%arg0: i32, %arg1: memref<2xi32, #tpu.memory_space<smem>>) -> (i32, i32, i32) {
    %c0_i32 = arith.constant 0 : i32
    %c0_i32_0 = arith.constant 0 : i32
    %c0_i32_1 = arith.constant 0 : i32
    %c0_i32_2 = arith.constant 0 : i32
    return %c0_i32, %c0_i32_0, %c0_i32_1 : i32, i32, i32
  }
  func.func @transform_18(%arg0: i32, %arg1: memref<2xi32, #tpu.memory_space<smem>>) -> (i32, i32) {
    %c0_i32 = arith.constant 0 : i32
    %c0_i32_0 = arith.constant 0 : i32
    %c0_i32_1 = arith.constant 0 : i32
    return %c0_i32, %c0_i32_0 : i32, i32
  }
}

</mosaic_0001>

<bundles_post_ra>
// kernel: gnn_base_forward.1
= control target key start
LH: loop header
LB: loop body
LE: loop exit
PB: predicated region body
PF: predicated region fallthrough
CT: control target
= control target key end

     0   :  { %s4432_s0 = inlined_call_operand.vmem [shape: s32[2], index: 0, kind: input, shape index: {}]   ;;  %s4433_s1 = inlined_call_operand.vmem [shape: f32[16,80], index: 1, kind: input, shape index: {}]   ;;  %s4434_s2 = inlined_call_operand.vmem [shape: f32[16,16], index: 2, kind: input, shape index: {}]   ;;  %s4435_s3 = inlined_call_operand.vmem [shape: f32[16,256], index: 3, kind: input, shape index: {}]   ;;  %s4436_s4 = inlined_call_operand.vmem [shape: f32[80,256], index: 4, kind: input, shape index: {}]   ;;  %s4437_s5 = inlined_call_operand.vmem [shape: f32[1,256], index: 5, kind: input, shape index: {}]   ;;  %s4438_s6 = inlined_call_operand.vmem [shape: f32[1,256], index: 6, kind: input, shape index: {}]   ;;  %s4439_s7 = inlined_call_operand.vmem [shape: f32[1,256], index: 7, kind: input, shape index: {}]   ;;  %s4440_s8 = inlined_call_operand.vmem [shape: f32[256,256], index: 8, kind: input, shape index: {}]   ;;  %s4441_s9 = inlined_call_operand.vmem [shape: f32[1,256,256], index: 9, kind: input, shape index: {}]   ;;  %s4442_s10 = inlined_call_operand.vmem [shape: f32[1,1,256], index: 10, kind: input, shape index: {}]   ;;  %s4443_s11 = inlined_call_operand.vmem [shape: f32[256,32], index: 11, kind: input, shape index: {}]   ;;  %s4444_s12 = inlined_call_operand.vmem [shape: f32[2,64], index: 12, kind: input, shape index: {}]   ;;  %s4445_s13 = inlined_call_operand.vmem [shape: f32[32,256], index: 13, kind: input, shape index: {}]   ;;  %s4446_s14 = inlined_call_operand.vmem [shape: f32[1,256], index: 14, kind: input, shape index: {}]   ;;  %s4447_s15 = inlined_call_operand.vmem [shape: f32[1,64], index: 15, kind: input, shape index: {}]   ;;  %s4448_s16 = inlined_call_operand.vmem [shape: f32[1,64,256], index: 16, kind: input, shape index: {}]   ;;  %s4449_s17 = inlined_call_operand.vmem [shape: f32[1,1,256], index: 17, kind: input, shape index: {}]   ;;  %s4450_s18 = inlined_call_operand.vmem [shape: f32[1,1,64], index: 18, kind: input, shape index: {}]   ;;  %s4451_s19 = inlined_call_operand.hbm [shape: f32[2,64], index: 19, kind: output, shape index: {}]  }
   0x1   :  { %4455 = sst [smem:[#allocation8_spill]] %s4432_s0 }
   0x2   :  { %4456 = sst [smem:[#allocation9_spill]] %s4433_s1  ;;  %s4460_s20 = sld [smem:[#allocation8_spill]] }
   0x3   :  { %4457 = sst [smem:[#allocation10_spill]] %s4434_s2 }
   0x4   :  { %4458 = sst [smem:[#allocation11_spill]] %s4435_s3 }
   0x5   :  { %4459 = sst [smem:[#allocation12_spill]] %s4444_s12 }
   0x8   :  { %s24_s12 = sshll.u32 %s4460_s20, 4  ;;  %s25_s12 = int_to_ptr.vmem [resolvable:$true] %s24_s12 }
   0x9   :  { %s3021_s21 = scalar_lea.vmem %s25_s12, 16  ;;  %p3026_p1 = scmp.lt.s32.totalorder %s25_s12, %s25_s12 }
   0xa   :  { %p3022_p0 = scmp.ne.s32.totalorder %s25_s12, %s3021_s21  ;;  %p3027_p2 = scmp.lt.s32.totalorder %s3021_s21, %s3021_s21 }
   0xc   :  { %p3028_p3 = por %p3027_p2, %p3026_p1 }
   0xe   :  { %p3029_p4 = pnand %p3028_p3, %p3022_p0 }
  0x10   :  { %3032 = shalt.err (!%p3029_p4)  }
  0x11   :  { %s3059_s1 = smov [#allocation3]  }
  0x12   :  { %27 = dma.vmem_to_smem %s25_s12, 16, %s3059_s1, [#allocation2] }
  0x13   :  { %3055 = dma.done.wait [#allocation2], 16 }
  0x14   :  { %3056 = vsyncadd [#allocation2], 4294967280 }
  0x15   :  { %29 = sfence }
  0x16   :  { %v140_v0 = vld [vmem:[%s4436_s4 + $0x8] sm:$0xff]  ;;  %v142_v1 = vld [vmem:[%s4436_s4 + $0x18] sm:$0xff]  ;;  %v139_v2 = vld [vmem:[%s4436_s4] sm:$0xff]  ;;  %v3060_v7 = vmov 0.0   ;;  %s4461_s20 = sld [smem:[#allocation9_spill]]  ;;  %vm171_vm0 = vcmask 654336  }
  0x17   :  { %v2502_v3 = vpack.c.bf16 %v142_v1, %v140_v0  ;;  %v141_v4 = vld [vmem:[%s4436_s4 + $0x10] sm:$0xff]  ;;  %v144_v5 = vld [vmem:[%s4436_s4 + $0x28] sm:$0xff]  ;;  %v146_v6 = vld [vmem:[%s4436_s4 + $0x38] sm:$0xff]  ;;  %242 = vmatprep.mubr.f32.mxu0 %v3060_v7 }
  0x18   :  { %v2504_v8 = vpack.c.bf16 %v141_v4, %v139_v2  ;;  %v2506_v9 = vpack.c.bf16 %v146_v6, %v144_v5  ;;  %v143_v10 = vld [vmem:[%s4436_s4 + $0x20] sm:$0xff]  ;;  %v145_v11 = vld [vmem:[%s4436_s4 + $0x30] sm:$0xff]  ;;  %v148_v12 = vld [vmem:[%s4436_s4 + $0x48] sm:$0xff] }
  0x19   :  { %2503 = vmatprep.subr.bf16.mxu0 %v2502_v3  ;;  %v150_v13 = vld [vmem:[%s4436_s4 + $0x58] sm:$0xff]  ;;  %v2508_v14 = vpack.c.bf16 %v145_v11, %v143_v10  ;;  %v147_v16 = vld [vmem:[%s4436_s4 + $0x40] sm:$0xff]  ;;  %v149_v17 = vld [vmem:[%s4436_s4 + $0x50] sm:$0xff] }
  0x1a   :  { %2505 = vmatpush1.bf16.msra.mxu0 %v2504_v8  ;;  %v2510_v15 = vpack.c.bf16 %v150_v13, %v148_v12  ;;  %v152_v18 = vld [vmem:[%s4436_s4 + $0x68] sm:$0xff]  ;;  %v154_v19 = vld [vmem:[%s4436_s4 + $0x78] sm:$0xff]  ;;  %v151_v20 = vld [vmem:[%s4436_s4 + $0x60] sm:$0xff]  ;;  %v2512_v24 = vpack.c.bf16 %v149_v17, %v147_v16 }
  0x1b   :  { %2507 = vmatprep.subr.bf16.mxu0 %v2506_v9  ;;  %v153_v21 = vld [vmem:[%s4436_s4 + $0x70] sm:$0xff]  ;;  %v74_v22 = vld [vmem:[%s4440_s8 + $0x8] sm:$0xff]  ;;  %v76_v23 = vld [vmem:[%s4440_s8 + $0x18] sm:$0xff]  ;;  %v2514_v30 = vpack.c.bf16 %v154_v19, %v152_v18 }
  0x1c   :  { %v156_v25 = vld [vmem:[%s4436_s4 + $0x88] sm:$0xff]  ;;  %v3227_v26 = vpack.c.bf16 %v76_v23, %v74_v22  ;;  %v73_v27 = vld [vmem:[%s4440_s8] sm:$0xff]  ;;  %v75_v28 = vld [vmem:[%s4440_s8 + $0x10] sm:$0xff]  ;;  %v2516_v40 = vpack.c.bf16 %v153_v21, %v151_v20 }
  0x1d   :  { %v78_v29 = vld [vmem:[%s4440_s8 + $0x28] sm:$0xff]  ;;  %v3238_v31 = vpack.c.bf16 %v75_v28, %v73_v27  ;;  %v80_v32 = vld [vmem:[%s4440_s8 + $0x38] sm:$0xff]  ;;  %v77_v33 = vld [vmem:[%s4440_s8 + $0x20] sm:$0xff] }
  0x1e   :  { %2509 = vmatpush1.bf16.msra.mxu0 %v2508_v14  ;;  %v79_v34 = vld [vmem:[%s4440_s8 + $0x30] sm:$0xff]  ;;  %v158_v35 = vld [vmem:[%s4436_s4 + $0x98] sm:$0xff]  ;;  %2523 = vmatprep.subr.bf16.mxu1 %v3227_v26  ;;  %v3253_v36 = vpack.c.bf16 %v80_v32, %v78_v29  ;;  %v82_v37 = vld [vmem:[%s4440_s8 + $0x48] sm:$0xff] }
  0x1f   :  { %2511 = vmatprep.subr.bf16.mxu0 %v2510_v15  ;;  %v84_v38 = vld [vmem:[%s4440_s8 + $0x58] sm:$0xff]  ;;  %2525 = vmatpush1.bf16.msra.mxu1 %v3238_v31  ;;  %v3262_v39 = vpack.c.bf16 %v79_v34, %v77_v33  ;;  %v155_v41 = vld [vmem:[%s4436_s4 + $0x80] sm:$0xff]  ;;  %v83_v44 = vld [vmem:[%s4440_s8 + $0x50] sm:$0xff]  ;;  %v2518_v45 = vpack.c.bf16 %v158_v35, %v156_v25 }
  0x20   :  { %2527 = vmatprep.subr.bf16.mxu1 %v3253_v36  ;;  %v3268_v42 = vpack.c.bf16 %v84_v38, %v82_v37  ;;  %v81_v43 = vld [vmem:[%s4440_s8 + $0x40] sm:$0xff]  ;;  %v157_v46 = vld [vmem:[%s4436_s4 + $0x90] sm:$0xff]  ;;  %v86_v47 = vld [vmem:[%s4440_s8 + $0x68] sm:$0xff] }
  0x21   :  { %v88_v48 = vld [vmem:[%s4440_s8 + $0x78] sm:$0xff]  ;;  %v3286_v49 = vpack.c.bf16 %v83_v44, %v81_v43  ;;  %v2520_v50 = vpack.c.bf16 %v157_v46, %v155_v41  ;;  %v85_v52 = vld [vmem:[%s4440_s8 + $0x60] sm:$0xff]  ;;  %v87_v53 = vld [vmem:[%s4440_s8 + $0x70] sm:$0xff] }
  0x22   :  { %2513 = vmatpush1.bf16.msra.mxu0 %v2512_v24  ;;  %v3289_v51 = vpack.c.bf16 %v88_v48, %v86_v47  ;;  %v90_v54 = vld [vmem:[%s4440_s8 + $0x88] sm:$0xff]  ;;  %v92_v55 = vld [vmem:[%s4440_s8 + $0x98] sm:$0xff]  ;;  %v3304_v56 = vpack.c.bf16 %v87_v53, %v85_v52  ;;  %v137_v57 = vld [vmem:[%s4461_s20] sm:$0xff] }
  0x23   :  { %2515 = vmatprep.subr.bf16.mxu0 %v2514_v30  ;;  %2529 = vmatpush1.bf16.msra.mxu1 %v3262_v39  ;;  %v3310_v58 = vpack.c.bf16 %v92_v55, %v90_v54  ;;  %v89_v59 = vld [vmem:[%s4440_s8 + $0x80] sm:$0xff]  ;;  %v91_v60 = vld [vmem:[%s4440_s8 + $0x90] sm:$0xff]  ;;  %v94_v61 = vld [vmem:[%s4440_s8 + $0xa8] sm:$0xff] }
  0x24   :  { %2531 = vmatprep.subr.bf16.mxu1 %v3268_v42  ;;  %v96_v62 = vld [vmem:[%s4440_s8 + $0xb8] sm:$0xff]  ;;  %v3327_v63 = vpack.c.bf16 %v91_v60, %v89_v59  ;;  %v138_v0 = vld [vmem:[%s4461_s20 + $0x8] sm:$0xff]  ;;  %v93_v2 = vld [vmem:[%s4440_s8 + $0xa0] sm:$0xff] }
  0x25   :  { %v3334_v1 = vpack.c.bf16 %v96_v62, %v94_v61  ;;  %v95_v3 = vld [vmem:[%s4440_s8 + $0xb0] sm:$0xff]  ;;  %v98_v4 = vld [vmem:[%s4440_s8 + $0xc8] sm:$0xff]  ;;  %v100_v5 = vld [vmem:[%s4440_s8 + $0xd8] sm:$0xff] }
  0x26   :  { %2517 = vmatpush1.bf16.msra.mxu0 %v2516_v40  ;;  %v3352_v6 = vpack.c.bf16 %v95_v3, %v93_v2 }
  0x27   :  { %2519 = vmatprep.subr.bf16.mxu0 %v2518_v45  ;;  %2533 = vmatpush1.bf16.msra.mxu1 %v3286_v49 }
  0x28   :  { %2535 = vmatprep.subr.bf16.mxu1 %v3289_v51 }
  0x2a   :  { %2521 = vmatpush1.bf16.msra.mxu0 %v2520_v50 }
  0x2b   :  { %2587 = vmatprep.subr.bf16.mxu0 %v3227_v26  ;;  %2537 = vmatpush1.bf16.msra.mxu1 %v3304_v56 }
  0x2c   :  { %2539 = vmatprep.subr.bf16.mxu1 %v3310_v58 }
  0x2d   :  { %2320 = vmatmul.mubr.msk.f32.vlgmr.msra.gmra.mrb[0].mxu0 %vm171_vm0, %v137_v57 }
  0x2e   :  { %248 = vmatprep.mubr.f32.mxu0 %v3060_v7  ;;  %2589 = vmatpush1.bf16.msra.mxu0 %v3238_v31 }
  0x2f   :  { %2591 = vmatprep.subr.bf16.mxu0 %v3253_v36  ;;  %2541 = vmatpush1.bf16.msra.mxu1 %v3327_v63 }
  0x31   :  { %2321 = vmatmul.mubr.msk.f32.gmra.mrb[2].mxu0 %vm171_vm0, %v138_v0 }
  0x32   :  { %30 = vsyncpa [#allocation5], 0  ;;  %2543 = vmatprep.subr.bf16.mxu1 %v3334_v1  ;;  %v3355_v8 = vpack.c.bf16 %v100_v5, %v98_v4  ;;  %v97_v9 = vld [vmem:[%s4440_s8 + $0xc0] sm:$0xff]  ;;  %v99_v10 = vld [vmem:[%s4440_s8 + $0xd0] sm:$0xff]  ;;  %2593 = vmatpush1.bf16.msra.mxu0 %v3262_v39  ;;  %vm931_vm1 = vcmask 261120   ;;  %vm1036_vm2 = vcmask 523264  }
  0x33   :  { %v102_v11 = vld [vmem:[%s4440_s8 + $0xe8] sm:$0xff]  ;;  %v104_v12 = vld [vmem:[%s4440_s8 + $0xf8] sm:$0xff]  ;;  %2595 = vmatprep.subr.bf16.mxu0 %v3268_v42  ;;  %2545 = vmatpush1.bf16.msra.mxu1 %v3352_v6  ;;  %v3372_v13 = vpack.c.bf16 %v99_v10, %v97_v9  ;;  %v101_v15 = vld [vmem:[%s4440_s8 + $0xe0] sm:$0xff]  ;;  %s4466_s26 = sld [smem:[#allocation10_spill]]  ;;  %vm1140_vm5 = vcmask 130048   ;;  %vm3064_vm15 = vmmov 0  }
  0x34   :  { %2547 = vmatprep.subr.bf16.mxu1 %v3355_v8  ;;  %v3375_v14 = vpack.c.bf16 %v104_v12, %v102_v11  ;;  %v103_v16 = vld [vmem:[%s4440_s8 + $0xf0] sm:$0xff]  ;;  %v106_v17 = vld [vmem:[%s4440_s8 + $0x108] sm:$0xff]  ;;  %v108_v18 = vld [vmem:[%s4440_s8 + $0x118] sm:$0xff] }
  0x35   :  { %v3392_v19 = vpack.c.bf16 %v103_v16, %v101_v15  ;;  %v3395_v20 = vpack.c.bf16 %v108_v18, %v106_v17  ;;  %v105_v21 = vld [vmem:[%s4440_s8 + $0x100] sm:$0xff]  ;;  %v107_v22 = vld [vmem:[%s4440_s8 + $0x110] sm:$0xff]  ;;  %v110_v23 = vld [vmem:[%s4440_s8 + $0x128] sm:$0xff]  ;;  %v161_v18 = vlaneseq }
  0x36   :  { %2597 = vmatpush1.bf16.msra.mxu0 %v3286_v49  ;;  %v112_v24 = vld [vmem:[%s4440_s8 + $0x138] sm:$0xff]  ;;  %v3412_v25 = vpack.c.bf16 %v107_v22, %v105_v21  ;;  %v109_v28 = vld [vmem:[%s4440_s8 + $0x120] sm:$0xff]  ;;  %v111_v29 = vld [vmem:[%s4440_s8 + $0x130] sm:$0xff] }
  0x37   :  { %2599 = vmatprep.subr.bf16.mxu0 %v3289_v51  ;;  %2549 = vmatpush1.bf16.msra.mxu1 %v3372_v13  ;;  %v3415_v27 = vpack.c.bf16 %v112_v24, %v110_v23  ;;  %v114_v30 = vld [vmem:[%s4440_s8 + $0x148] sm:$0xff]  ;;  %v116_v32 = vld [vmem:[%s4440_s8 + $0x158] sm:$0xff]  ;;  %v3432_v33 = vpack.c.bf16 %v111_v29, %v109_v28  ;;  %v113_v35 = vld [vmem:[%s4440_s8 + $0x140] sm:$0xff]  ;;  %v3561_v21 = vshrl.u32 %v161_v18, 7 }
  0x38   :  { %2551 = vmatprep.subr.bf16.mxu1 %v3375_v14  ;;  %v3435_v34 = vpack.c.bf16 %v116_v32, %v114_v30  ;;  %v115_v37 = vld [vmem:[%s4440_s8 + $0x150] sm:$0xff]  ;;  %v118_v38 = vld [vmem:[%s4440_s8 + $0x168] sm:$0xff]  ;;  %v120_v40 = vld [vmem:[%s4440_s8 + $0x178] sm:$0xff] }
  0x39   :  { %v3452_v41 = vpack.c.bf16 %v115_v37, %v113_v35  ;;  %v3455_v43 = vpack.c.bf16 %v120_v40, %v118_v38  ;;  %v117_v44 = vld [vmem:[%s4440_s8 + $0x160] sm:$0xff]  ;;  %v119_v45 = vld [vmem:[%s4440_s8 + $0x170] sm:$0xff]  ;;  %v122_v46 = vld [vmem:[%s4440_s8 + $0x188] sm:$0xff]  ;;  %v3564_v22 = vsub.s32 0, %v3561_v21  ;;  %v3570_v24 = vsub.s32 1, %v3561_v21 }
  0x3a   :  { %2601 = vmatpush1.bf16.msra.mxu0 %v3304_v56  ;;  %v124_v47 = vld [vmem:[%s4440_s8 + $0x198] sm:$0xff]  ;;  %v3472_v48 = vpack.c.bf16 %v119_v45, %v117_v44  ;;  %v121_v52 = vld [vmem:[%s4440_s8 + $0x180] sm:$0xff]  ;;  %v123_v53 = vld [vmem:[%s4440_s8 + $0x190] sm:$0xff]  ;;  %vm2207_vm0 = vcmp.eq.s32.totalorder %v3561_v21, 0 }
  0x3b   :  { %2603 = vmatprep.subr.bf16.mxu0 %v3310_v58  ;;  %2553 = vmatpush1.bf16.msra.mxu1 %v3392_v19  ;;  %v3475_v50 = vpack.c.bf16 %v124_v47, %v122_v46  ;;  %v126_v54 = vld [vmem:[%s4440_s8 + $0x1a8] sm:$0xff]  ;;  %v128_v55 = vld [vmem:[%s4440_s8 + $0x1b8] sm:$0xff]  ;;  %v3492_v57 = vpack.c.bf16 %v123_v53, %v121_v52  ;;  %v125_v60 = vld [vmem:[%s4440_s8 + $0x1a0] sm:$0xff] }
  0x3c   :  { %2555 = vmatprep.subr.bf16.mxu1 %v3395_v20  ;;  %v3495_v59 = vpack.c.bf16 %v128_v55, %v126_v54  ;;  %v127_v61 = vld [vmem:[%s4440_s8 + $0x1b0] sm:$0xff]  ;;  %v130_v62 = vld [vmem:[%s4440_s8 + $0x1c8] sm:$0xff]  ;;  %v132_v0 = vld [vmem:[%s4440_s8 + $0x1d8] sm:$0xff] }
  0x3d   :  { %v3512_v2 = vpack.c.bf16 %v127_v61, %v125_v60  ;;  %v3515_v3 = vpack.c.bf16 %v132_v0, %v130_v62  ;;  %v129_v4 = vld [vmem:[%s4440_s8 + $0x1c0] sm:$0xff]  ;;  %v131_v5 = vld [vmem:[%s4440_s8 + $0x1d0] sm:$0xff]  ;;  %v134_v10 = vld [vmem:[%s4440_s8 + $0x1e8] sm:$0xff] }
  0x3e   :  { %2605 = vmatpush1.bf16.msra.mxu0 %v3327_v63  ;;  %v3535_v9 = vpack.c.bf16 %v131_v5, %v129_v4  ;;  %v136_v11 = vld [vmem:[%s4440_s8 + $0x1f8] sm:$0xff]  ;;  %v133_v15 = vld [vmem:[%s4440_s8 + $0x1e0] sm:$0xff]  ;;  %v135_v16 = vld [vmem:[%s4440_s8 + $0x1f0] sm:$0xff] }
  0x3f   :  { %2607 = vmatprep.subr.bf16.mxu0 %v3334_v1  ;;  %2557 = vmatpush1.bf16.msra.mxu1 %v3412_v25  ;;  %v3545_v12 = vpack.c.bf16 %v136_v11, %v134_v10  ;;  %v3553_v17 = vpack.c.bf16 %v135_v16, %v133_v15  ;;  %v159_v23 = vld [vmem:[%s4437_s5] sm:$0x3]  ;;  %v460_v54 = vld [vmem:[%s4441_s9 + $0x8] sm:$0xff]  ;;  %v462_v55 = vld [vmem:[%s4441_s9 + $0x18] sm:$0xff] }
  0x40   :  { %2559 = vmatprep.subr.bf16.mxu1 %v3415_v27  ;;  %v164_v28 = vrot.slane %v159_v23, %v3564_v22  ;;  %v168_v29 = vrot.slane %v159_v23, %v3570_v24  ;;  %v459_v60 = vld [vmem:[%s4441_s9] sm:$0xff]  ;;  %v2650_v61 = vpack.c.bf16 %v462_v55, %v460_v54  ;;  %v461_v62 = vld [vmem:[%s4441_s9 + $0x10] sm:$0xff]  ;;  %v464_v0 = vld [vmem:[%s4441_s9 + $0x28] sm:$0xff] }
  0x41   :  { %v466_v4 = vld [vmem:[%s4441_s9 + $0x38] sm:$0xff]  ;;  %v2652_v5 = vpack.c.bf16 %v461_v62, %v459_v60  ;;  %v463_v11 = vld [vmem:[%s4441_s9 + $0x20] sm:$0xff]  ;;  %v465_v15 = vld [vmem:[%s4441_s9 + $0x30] sm:$0xff] }
  0x42   :  { %2609 = vmatpush1.bf16.msra.mxu0 %v3352_v6  ;;  %v2654_v10 = vpack.c.bf16 %v466_v4, %v464_v0  ;;  %v468_v16 = vld [vmem:[%s4441_s9 + $0x48] sm:$0xff]  ;;  %v470_v23 = vld [vmem:[%s4441_s9 + $0x58] sm:$0xff]  ;;  %v471_v60 = vld [vmem:[%s4441_s9 + $0x60] sm:$0xff] }
  0x43   :  { %2611 = vmatprep.subr.bf16.mxu0 %v3355_v8  ;;  %2561 = vmatpush1.bf16.msra.mxu1 %v3432_v33  ;;  %v476_v62 = vld [vmem:[%s4441_s9 + $0x88] sm:$0xff]  ;;  %v478_v0 = vld [vmem:[%s4441_s9 + $0x98] sm:$0xff]  ;;  %vm4133_vm3 = vmpackc.low %vm1036_vm2, %vm1036_vm2 }
  0x44   :  { %2563 = vmatprep.subr.bf16.mxu1 %v3435_v34 }
  0x46   :  { %2613 = vmatpush1.bf16.msra.mxu0 %v3372_v13 }
  0x47   :  { %2615 = vmatprep.subr.bf16.mxu0 %v3375_v14  ;;  %2565 = vmatpush1.bf16.msra.mxu1 %v3452_v41 }
  0x48   :  { %2567 = vmatprep.subr.bf16.mxu1 %v3455_v43 }
  0x4a   :  { %2617 = vmatpush1.bf16.msra.mxu0 %v3392_v19 }
  0x4b   :  { %2619 = vmatprep.subr.bf16.mxu0 %v3395_v20  ;;  %2569 = vmatpush1.bf16.msra.mxu1 %v3472_v48 }
  0x4c   :  { %2571 = vmatprep.subr.bf16.mxu1 %v3475_v50 }
  0x4e   :  { %2621 = vmatpush1.bf16.msra.mxu0 %v3412_v25 }
  0x4f   :  { %2623 = vmatprep.subr.bf16.mxu0 %v3415_v27  ;;  %2573 = vmatpush1.bf16.msra.mxu1 %v3492_v57 }
  0x50   :  { %2575 = vmatprep.subr.bf16.mxu1 %v3495_v59 }
  0x52   :  { %2625 = vmatpush1.bf16.msra.mxu0 %v3432_v33 }
  0x53   :  { %2627 = vmatprep.subr.bf16.mxu0 %v3435_v34  ;;  %2577 = vmatpush1.bf16.msra.mxu1 %v3512_v2 }
  0x54   :  { %2579 = vmatprep.subr.bf16.mxu1 %v3515_v3 }
  0x56   :  { %2629 = vmatpush1.bf16.msra.mxu0 %v3452_v41 }
  0x57   :  { %2631 = vmatprep.subr.bf16.mxu0 %v3455_v43  ;;  %2581 = vmatpush1.bf16.msra.mxu1 %v3535_v9 }
  0x58   :  { %2583 = vmatprep.subr.bf16.mxu1 %v3545_v12 }
  0x5a   :  { %2633 = vmatpush1.bf16.msra.mxu0 %v3472_v48 }
  0x5b   :  { %2635 = vmatprep.subr.bf16.mxu0 %v3475_v50  ;;  %2585 = vmatpush1.bf16.msra.mxu1 %v3553_v17 }
  0x5c   :  { %2651 = vmatprep.subr.bf16.mxu1 %v2650_v61  ;;  %v473_v61 = vld [vmem:[%s4441_s9 + $0x70] sm:$0xff] }
  0x5d   :  { %v2664_v4 = vpack.c.bf16 %v473_v61, %v471_v60  ;;  %v485_v60 = vld [vmem:[%s4441_s9 + $0xd0] sm:$0xff]  ;;  %v488_v61 = vld [vmem:[%s4441_s9 + $0xe8] sm:$0xff] }
  0x5e   :  { %2637 = vmatpush1.bf16.msra.mxu0 %v3492_v57 }
  0x5f   :  { %2639 = vmatprep.subr.bf16.mxu0 %v3495_v59 }
  0x62   :  { %2641 = vmatpush1.bf16.msra.mxu0 %v3512_v2 }
  0x63   :  { %2643 = vmatprep.subr.bf16.mxu0 %v3515_v3 }
  0x66   :  { %2645 = vmatpush1.bf16.msra.mxu0 %v3535_v9 }
  0x67   :  { %2647 = vmatprep.subr.bf16.mxu0 %v3545_v12 }
  0x6a   :  { %2649 = vmatpush1.bf16.msra.mxu0 %v3553_v17 }
  0x6b   :  { %2715 = vmatprep.subr.bf16.mxu0 %v3227_v26 }
 0x100   :  { %v244_v30 = vpop.f32.mrb[0].mxu0 }
 0x101   :  { %v3574_v32 = vadd.f32 %v244_v30, %v164_v28  ;;  %v246_v35 = vpop.f32.mrb[1].mxu0  ;;  %v467_v30 = vld [vmem:[%s4441_s9 + $0x40] sm:$0xff] }
 0x102   :  { %v3576_v37 = vadd.f32 %v246_v35, %v168_v29  ;;  %v469_v35 = vld [vmem:[%s4441_s9 + $0x50] sm:$0xff] }
 0x103   :  { %v255_v44 = vmax.f32 %v3574_v32, 0.0  ;;  %v2660_v54 = vpack.c.bf16 %v469_v35, %v467_v30  ;;  %v481_v30 = vld [vmem:[%s4441_s9 + $0xb0] sm:$0xff]  ;;  %v484_v35 = vld [vmem:[%s4441_s9 + $0xc8] sm:$0xff] }
 0x104   :  { %v256_v38 = vmax.f32 %v3576_v37, 0.0  ;;  %v250_v40 = vpop.f32.mrb[2].mxu0 }
 0x105   :  { %v3580_v45 = vadd.f32 %v250_v40, %v164_v28  ;;  %v252_v46 = vpop.f32.mrb[3].mxu0  ;;  %v2656_v28 = vpack.c.bf16 %v465_v15, %v463_v11  ;;  %v472_v40 = vld [vmem:[%s4441_s9 + $0x68] sm:$0xff]  ;;  %v477_v11 = vld [vmem:[%s4441_s9 + $0x90] sm:$0xff] }
 0x106   :  { %v3582_v47 = vadd.f32 %v252_v46, %v168_v29  ;;  %323 = vmatprep.mubr.f32.mxu1 %v256_v38  ;;  %v2658_v29 = vpack.c.bf16 %v470_v23, %v468_v16  ;;  %v474_v46 = vld [vmem:[%s4441_s9 + $0x78] sm:$0xff]  ;;  %v480_v15 = vld [vmem:[%s4441_s9 + $0xa8] sm:$0xff] }
 0x107   :  { %324 = vmatmul.mubr.f32.vlgmr.msra.gmra.mrb[0].mxu1 %v255_v44  ;;  %v257_v53 = vmax.f32 %v3580_v45, 0.0  ;;  %v2662_v55 = vpack.c.bf16 %v474_v46, %v472_v40  ;;  %v482_v16 = vld [vmem:[%s4441_s9 + $0xb8] sm:$0xff] }
 0x108   :  { %v258_v52 = vmax.f32 %v3582_v47, 0.0  ;;  %2653 = vmatpush1.bf16.msra.mxu1 %v2652_v5  ;;  %v2666_v5 = vpack.c.bf16 %v478_v0, %v476_v62  ;;  %v486_v40 = vld [vmem:[%s4441_s9 + $0xd8] sm:$0xff] }
 0x109   :  { %2655 = vmatprep.subr.bf16.mxu1 %v2654_v10  ;;  %v475_v10 = vld [vmem:[%s4441_s9 + $0x80] sm:$0xff]  ;;  %v490_v62 = vld [vmem:[%s4441_s9 + $0xf8] sm:$0xff] }
 0x10a   :  { %329 = vmatprep.mubr.f32.mxu1 %v258_v52  ;;  %v2668_v23 = vpack.c.bf16 %v477_v11, %v475_v10  ;;  %v489_v10 = vld [vmem:[%s4441_s9 + $0xf0] sm:$0xff]  ;;  %v492_v11 = vld [vmem:[%s4441_s9 + $0x108] sm:$0xff]  ;;  %v506_v45 = vld [vmem:[%s4441_s9 + $0x178] sm:$0xff] }
 0x10b   :  { %330 = vmatmul.mubr.f32.gmra.mrb[2].mxu1 %v257_v53 }
 0x10c   :  { %2657 = vmatpush1.bf16.msra.mxu1 %v2656_v28  ;;  %v2670_v28 = vpack.c.bf16 %v482_v16, %v480_v15  ;;  %v494_v15 = vld [vmem:[%s4441_s9 + $0x118] sm:$0xff] }
 0x10d   :  { %2659 = vmatprep.subr.bf16.mxu1 %v2658_v29  ;;  %v479_v29 = vld [vmem:[%s4441_s9 + $0xa0] sm:$0xff] }
 0x10e   :  { %v2672_v46 = vpack.c.bf16 %v481_v30, %v479_v29  ;;  %v493_v29 = vld [vmem:[%s4441_s9 + $0x110] sm:$0xff]  ;;  %v496_v30 = vld [vmem:[%s4441_s9 + $0x128] sm:$0xff] }
 0x110   :  { %2661 = vmatpush1.bf16.msra.mxu1 %v2660_v54  ;;  %v2674_v54 = vpack.c.bf16 %v486_v40, %v484_v35  ;;  %v498_v35 = vld [vmem:[%s4441_s9 + $0x138] sm:$0xff] }
 0x111   :  { %2663 = vmatprep.subr.bf16.mxu1 %v2662_v55  ;;  %v483_v55 = vld [vmem:[%s4441_s9 + $0xc0] sm:$0xff] }
 0x112   :  { %v2676_v0 = vpack.c.bf16 %v485_v60, %v483_v55  ;;  %v497_v55 = vld [vmem:[%s4441_s9 + $0x130] sm:$0xff]  ;;  %v500_v60 = vld [vmem:[%s4441_s9 + $0x148] sm:$0xff] }
 0x114   :  { %2665 = vmatpush1.bf16.msra.mxu1 %v2664_v4  ;;  %v2678_v4 = vpack.c.bf16 %v490_v62, %v488_v61  ;;  %v502_v61 = vld [vmem:[%s4441_s9 + $0x158] sm:$0xff] }
 0x115   :  { %2667 = vmatprep.subr.bf16.mxu1 %v2666_v5  ;;  %v487_v5 = vld [vmem:[%s4441_s9 + $0xe0] sm:$0xff] }
 0x116   :  { %v2680_v16 = vpack.c.bf16 %v489_v10, %v487_v5  ;;  %v501_v5 = vld [vmem:[%s4441_s9 + $0x150] sm:$0xff] }
 0x118   :  { %2669 = vmatpush1.bf16.msra.mxu1 %v2668_v23  ;;  %v2682_v23 = vpack.c.bf16 %v494_v15, %v492_v11 }
 0x119   :  { %2671 = vmatprep.subr.bf16.mxu1 %v2670_v28  ;;  %v491_v28 = vld [vmem:[%s4441_s9 + $0x100] sm:$0xff] }
 0x11a   :  { %v2684_v40 = vpack.c.bf16 %v493_v29, %v491_v28 }
 0x11c   :  { %2673 = vmatpush1.bf16.msra.mxu1 %v2672_v46  ;;  %v2686_v46 = vpack.c.bf16 %v498_v35, %v496_v30 }
 0x11d   :  { %2675 = vmatprep.subr.bf16.mxu1 %v2674_v54  ;;  %v495_v54 = vld [vmem:[%s4441_s9 + $0x120] sm:$0xff] }
 0x11e   :  { %v2688_v62 = vpack.c.bf16 %v497_v55, %v495_v54  ;;  %v508_v54 = vld [vmem:[%s4441_s9 + $0x188] sm:$0xff]  ;;  %v510_v55 = vld [vmem:[%s4441_s9 + $0x198] sm:$0xff] }
 0x120   :  { %2677 = vmatpush1.bf16.msra.mxu1 %v2676_v0  ;;  %v2690_v0 = vpack.c.bf16 %v502_v61, %v500_v60  ;;  %v2698_v60 = vpack.c.bf16 %v510_v55, %v508_v54  ;;  %v507_v61 = vld [vmem:[%s4441_s9 + $0x180] sm:$0xff] }
 0x121   :  { %2679 = vmatprep.subr.bf16.mxu1 %v2678_v4  ;;  %v499_v4 = vld [vmem:[%s4441_s9 + $0x140] sm:$0xff] }
 0x122   :  { %v2692_v10 = vpack.c.bf16 %v501_v5, %v499_v4  ;;  %v512_v4 = vld [vmem:[%s4441_s9 + $0x1a8] sm:$0xff]  ;;  %v514_v5 = vld [vmem:[%s4441_s9 + $0x1b8] sm:$0xff] }
 0x124   :  { %2681 = vmatpush1.bf16.msra.mxu1 %v2680_v16 }
 0x125   :  { %2683 = vmatprep.subr.bf16.mxu1 %v2682_v23 }
 0x128   :  { %2685 = vmatpush1.bf16.msra.mxu1 %v2684_v40 }
 0x129   :  { %2687 = vmatprep.subr.bf16.mxu1 %v2686_v46 }
 0x12c   :  { %2689 = vmatpush1.bf16.msra.mxu1 %v2688_v62  ;;  %v509_v62 = vld [vmem:[%s4441_s9 + $0x190] sm:$0xff] }
 0x12d   :  { %2691 = vmatprep.subr.bf16.mxu1 %v2690_v0  ;;  %v2700_v0 = vpack.c.bf16 %v509_v62, %v507_v61 }
 0x130   :  { %2693 = vmatpush1.bf16.msra.mxu1 %v2692_v10  ;;  %v2702_v10 = vpack.c.bf16 %v514_v5, %v512_v4 }
 0x1da   :  { %v325_v11 = vpop.f32.mrb[0].mxu1 }
 0x1db   :  { %v3728_v15 = vsub.f32 %v255_v44, %v325_v11  ;;  %v327_v16 = vpop.f32.mrb[1].mxu1  ;;  %v504_v44 = vld [vmem:[%s4441_s9 + $0x168] sm:$0xff]  ;;  %v511_v11 = vld [vmem:[%s4441_s9 + $0x1a0] sm:$0xff] }
 0x1dc   :  { %v3732_v23 = vsub.f32 %v256_v38, %v327_v16  ;;  %v2694_v47 = vpack.c.bf16 %v506_v45, %v504_v44  ;;  %v513_v16 = vld [vmem:[%s4441_s9 + $0x1b0] sm:$0xff]  ;;  %v520_v45 = vld [vmem:[%s4441_s9 + $0x1e8] sm:$0xff] }
 0x1dd   :  { %v340_v30 = vmul.f32 %v3728_v15, %v3728_v15 }
 0x1de   :  { %v341_v28 = vmul.f32 %v3732_v23, %v3732_v23  ;;  %v331_v29 = vpop.f32.mrb[2].mxu1  ;;  %2695 = vmatprep.subr.bf16.mxu1 %v2694_v47  ;;  %v522_v47 = vld [vmem:[%s4441_s9 + $0x1f8] sm:$0xff] }
 0x1df   :  { %v3740_v35 = vsub.f32 %v257_v53, %v331_v29  ;;  %v333_v40 = vpop.f32.mrb[3].mxu1  ;;  %v505_v53 = vld [vmem:[%s4441_s9 + $0x170] sm:$0xff]  ;;  %v516_v29 = vld [vmem:[%s4441_s9 + $0x1c8] sm:$0xff] }
 0x1e0   :  { %v3744_v32 = vsub.f32 %v258_v52, %v333_v40  ;;  %408 = vmatprep.mubr.f32.mxu0 %v341_v28  ;;  %v503_v52 = vld [vmem:[%s4441_s9 + $0x160] sm:$0xff]  ;;  %v2704_v28 = vpack.c.bf16 %v513_v16, %v511_v11 }
 0x1e1   :  { %409 = vmatmul.mubr.f32.vlgmr.msra.gmra.mrb[4].mxu0 %v340_v30  ;;  %v342_v38 = vmul.f32 %v3740_v35, %v3740_v35  ;;  %v2696_v46 = vpack.c.bf16 %v505_v53, %v503_v52  ;;  %v518_v30 = vld [vmem:[%s4441_s9 + $0x1d8] sm:$0xff]  ;;  %v519_v52 = vld [vmem:[%s4441_s9 + $0x1e0] sm:$0xff]  ;;  %v2710_v53 = vpack.c.bf16 %v522_v47, %v520_v45 }
 0x1e2   :  { %v343_v37 = vmul.f32 %v3744_v32, %v3744_v32  ;;  %2717 = vmatpush1.bf16.msra.mxu0 %v3238_v31  ;;  %v2706_v40 = vpack.c.bf16 %v518_v30, %v516_v29  ;;  %v71_v11 = vld [vmem:[%s4438_s6] sm:$0x3]  ;;  %s4463_s6 = sld [smem:[#allocation12_spill]] }
 0x1e3   :  { %2719 = vmatprep.subr.bf16.mxu0 %v3253_v36  ;;  %2697 = vmatpush1.bf16.msra.mxu1 %v2696_v46  ;;  %v521_v46 = vld [vmem:[%s4441_s9 + $0x1f0] sm:$0xff]  ;;  %v3849_v16 = vrot.slane %v71_v11, %v3564_v22  ;;  %v3852_v29 = vrot.slane %v71_v11, %v3570_v24 }
 0x1e4   :  { %414 = vmatprep.mubr.f32.mxu0 %v343_v37  ;;  %2699 = vmatprep.subr.bf16.mxu1 %v2698_v60  ;;  %v515_v37 = vld [vmem:[%s4441_s9 + $0x1c0] sm:$0xff]  ;;  %v2712_v54 = vpack.c.bf16 %v521_v46, %v519_v52 }
 0x1e5   :  { %415 = vmatmul.mubr.f32.gmra.mrb[6].mxu0 %v342_v38  ;;  %v517_v38 = vld [vmem:[%s4441_s9 + $0x1d0] sm:$0xff] }
 0x1e6   :  { %2721 = vmatpush1.bf16.msra.mxu0 %v3262_v39  ;;  %v2708_v44 = vpack.c.bf16 %v517_v38, %v515_v37 }
 0x1e7   :  { %2723 = vmatprep.subr.bf16.mxu0 %v3268_v42  ;;  %2701 = vmatpush1.bf16.msra.mxu1 %v2700_v0 }
 0x1e8   :  { %2703 = vmatprep.subr.bf16.mxu1 %v2702_v10 }
 0x1ea   :  { %2725 = vmatpush1.bf16.msra.mxu0 %v3286_v49 }
 0x1eb   :  { %2727 = vmatprep.subr.bf16.mxu0 %v3289_v51  ;;  %2705 = vmatpush1.bf16.msra.mxu1 %v2704_v28 }
 0x1ec   :  { %2707 = vmatprep.subr.bf16.mxu1 %v2706_v40 }
 0x1ee   :  { %2729 = vmatpush1.bf16.msra.mxu0 %v3304_v56 }
 0x1ef   :  { %2731 = vmatprep.subr.bf16.mxu0 %v3310_v58  ;;  %2709 = vmatpush1.bf16.msra.mxu1 %v2708_v44 }
 0x1f0   :  { %2711 = vmatprep.subr.bf16.mxu1 %v2710_v53 }
 0x1f2   :  { %2733 = vmatpush1.bf16.msra.mxu0 %v3327_v63 }
 0x1f3   :  { %2735 = vmatprep.subr.bf16.mxu0 %v3334_v1  ;;  %2713 = vmatpush1.bf16.msra.mxu1 %v2712_v54 }
 0x1f4   :  { %2779 = vmatprep.subr.bf16.mxu1 %v3227_v26  ;;  %v72_v26 = vld [vmem:[%s4439_s7] sm:$0x3] }
 0x1f5   :  { %v3857_v38 = vrot.slane %v72_v26, %v3570_v24  ;;  %v3860_v44 = vrot.slane %v72_v26, %v3564_v22 }
 0x1f6   :  { %2737 = vmatpush1.bf16.msra.mxu0 %v3352_v6 }
 0x1f7   :  { %2739 = vmatprep.subr.bf16.mxu0 %v3355_v8 }
 0x1fa   :  { %2741 = vmatpush1.bf16.msra.mxu0 %v3372_v13 }
 0x1fb   :  { %2743 = vmatprep.subr.bf16.mxu0 %v3375_v14 }
 0x1fe   :  { %2745 = vmatpush1.bf16.msra.mxu0 %v3392_v19 }
 0x1ff   :  { %2747 = vmatprep.subr.bf16.mxu0 %v3395_v20 }
 0x202   :  { %2749 = vmatpush1.bf16.msra.mxu0 %v3412_v25 }
 0x203   :  { %2751 = vmatprep.subr.bf16.mxu0 %v3415_v27 }
 0x206   :  { %2753 = vmatpush1.bf16.msra.mxu0 %v3432_v33 }
 0x207   :  { %2755 = vmatprep.subr.bf16.mxu0 %v3435_v34 }
 0x20a   :  { %2757 = vmatpush1.bf16.msra.mxu0 %v3452_v41 }
 0x20b   :  { %2759 = vmatprep.subr.bf16.mxu0 %v3455_v43 }
 0x20e   :  { %2761 = vmatpush1.bf16.msra.mxu0 %v3472_v48 }
 0x20f   :  { %2763 = vmatprep.subr.bf16.mxu0 %v3475_v50 }
 0x212   :  { %2765 = vmatpush1.bf16.msra.mxu0 %v3492_v57 }
 0x213   :  { %2767 = vmatprep.subr.bf16.mxu0 %v3495_v59 }
 0x216   :  { %2769 = vmatpush1.bf16.msra.mxu0 %v3512_v2 }
 0x217   :  { %2771 = vmatprep.subr.bf16.mxu0 %v3515_v3 }
 0x21a   :  { %2773 = vmatpush1.bf16.msra.mxu0 %v3535_v9 }
 0x21b   :  { %2775 = vmatprep.subr.bf16.mxu0 %v3545_v12 }
 0x21e   :  { %2777 = vmatpush1.bf16.msra.mxu0 %v3553_v17 }
 0x2b4   :  { %v410_v55 = vpop.f32.mrb[4].mxu0 }
 0x2b5   :  { %v411_v60 = vadd.f32 1e-05, %v410_v55  ;;  %v412_v61 = vpop.f32.mrb[5].mxu0 }
 0x2b6   :  { %v413_v62 = vadd.f32 1e-05, %v412_v61 }
 0x2b7   :  { %2973 = vrsqrt.f32 %v411_v60 }
 0x2b8   :  { %2975 = vrsqrt.f32 %v413_v62  ;;  %v416_v0 = vpop.f32.mrb[6].mxu0 }
 0x2b9   :  { %v417_v4 = vadd.f32 1e-05, %v416_v0  ;;  %v418_v5 = vpop.f32.mrb[7].mxu0 }
 0x2ba   :  { %v419_v10 = vadd.f32 1e-05, %v418_v5 }
 0x2bb   :  { %2977 = vrsqrt.f32 %v417_v4 }
 0x2bc   :  { %2979 = vrsqrt.f32 %v419_v10 }
 0x2c1   :  { %v2974_v28 = vpop.eup %2973 }
 0x2c2   :  { %v2976_v30 = vpop.eup %2975  ;;  %v425_v40 = vmul.f32 %v2974_v28, %v3728_v15  ;;  %v822_v28 = vld [vmem:[%s4443_s11 + $0xa0] sm:$0xff] }
 0x2c3   :  { %v426_v37 = vmul.f32 %v2976_v30, %v3732_v23  ;;  %v823_v30 = vld [vmem:[%s4443_s11 + $0xa8] sm:$0xff] }
 0x2c4   :  { %v440_v45 = vmul.f32 %v3849_v16, %v425_v40  ;;  %v2850_v40 = vpack.c.bf16 %v823_v30, %v822_v28 }
 0x2c5   :  { %v2978_v47 = vpop.eup %2977  ;;  %v441_v52 = vmul.f32 %v3852_v29, %v426_v37  ;;  %v806_v37 = vld [vmem:[%s4443_s11 + $0x20] sm:$0xff] }
 0x2c6   :  { %v2980_v53 = vpop.eup %2979  ;;  %v427_v46 = vmul.f32 %v2978_v47, %v3740_v35  ;;  %v455_v23 = vadd.f32 %v3860_v44, %v440_v45  ;;  %v807_v45 = vld [vmem:[%s4443_s11 + $0x28] sm:$0xff] }
 0x2c7   :  { %v456_v54 = vadd.f32 %v3857_v38, %v441_v52  ;;  %v428_v15 = vmul.f32 %v2980_v53, %v3744_v32  ;;  %v2852_v47 = vpack.c.bf16 %v807_v45, %v806_v37  ;;  %v824_v52 = vld [vmem:[%s4443_s11 + $0xb0] sm:$0xff]  ;;  %v825_v53 = vld [vmem:[%s4443_s11 + $0xb8] sm:$0xff] }
 0x2c8   :  { %v442_v55 = vmul.f32 %v3849_v16, %v427_v46  ;;  %v2854_v46 = vpack.c.bf16 %v825_v53, %v824_v52 }
 0x2c9   :  { %599 = vmatprep.mubr.f32.mxu1 %v456_v54  ;;  %v443_v60 = vmul.f32 %v3852_v29, %v428_v15  ;;  %v808_v54 = vld [vmem:[%s4443_s11 + $0x30] sm:$0xff]  ;;  %v809_v15 = vld [vmem:[%s4443_s11 + $0x38] sm:$0xff] }
 0x2ca   :  { %600 = vmatmul.mubr.f32.vlgmr.msra.gmra.mrb[4].mxu1 %v455_v23  ;;  %v457_v62 = vadd.f32 %v3860_v44, %v442_v55  ;;  %v2856_v23 = vpack.c.bf16 %v809_v15, %v808_v54  ;;  %v826_v55 = vld [vmem:[%s4443_s11 + $0xc0] sm:$0xff] }
 0x2cb   :  { %v458_v61 = vadd.f32 %v3857_v38, %v443_v60  ;;  %2781 = vmatpush1.bf16.msra.mxu1 %v3238_v31  ;;  %v523_v31 = vld [vmem:[%s4442_s10] sm:$0x3]  ;;  %v827_v60 = vld [vmem:[%s4443_s11 + $0xc8] sm:$0xff]  ;;  %s4462_s10 = sld [smem:[#allocation11_spill]] }
 0x2cc   :  { %2783 = vmatprep.subr.bf16.mxu1 %v3253_v36  ;;  %v528_v36 = vrot.slane %v523_v31, %v3564_v22 }
 0x2cd   :  { %605 = vmatprep.mubr.f32.mxu1 %v458_v61  ;;  %v2858_v61 = vpack.c.bf16 %v827_v60, %v826_v55 }
 0x2ce   :  { %606 = vmatmul.mubr.f32.gmra.mrb[6].mxu1 %v457_v62  ;;  %v810_v62 = vld [vmem:[%s4443_s11 + $0x40] sm:$0xff] }
 0x2cf   :  { %2785 = vmatpush1.bf16.msra.mxu1 %v3262_v39  ;;  %v532_v39 = vrot.slane %v523_v31, %v3570_v24  ;;  %v811_v31 = vld [vmem:[%s4443_s11 + $0x48] sm:$0xff] }
 0x2d0   :  { %2787 = vmatprep.subr.bf16.mxu1 %v3268_v42 }
 0x2d1   :  { %v795_v45 = vld [vmem:[%s4462_s10 + $0x8] sm:$0xff] }
 0x2d3   :  { %2789 = vmatpush1.bf16.msra.mxu1 %v3286_v49 }
 0x2d4   :  { %2791 = vmatprep.subr.bf16.mxu1 %v3289_v51 }
 0x2d7   :  { %2793 = vmatpush1.bf16.msra.mxu1 %v3304_v56 }
 0x2d8   :  { %2795 = vmatprep.subr.bf16.mxu1 %v3310_v58 }
 0x2db   :  { %2797 = vmatpush1.bf16.msra.mxu1 %v3327_v63 }
 0x2dc   :  { %2799 = vmatprep.subr.bf16.mxu1 %v3334_v1 }
 0x2df   :  { %2801 = vmatpush1.bf16.msra.mxu1 %v3352_v6 }
 0x2e0   :  { %2803 = vmatprep.subr.bf16.mxu1 %v3355_v8 }
 0x2e3   :  { %2805 = vmatpush1.bf16.msra.mxu1 %v3372_v13 }
 0x2e4   :  { %2807 = vmatprep.subr.bf16.mxu1 %v3375_v14 }
 0x2e7   :  { %2809 = vmatpush1.bf16.msra.mxu1 %v3392_v19 }
 0x2e8   :  { %2811 = vmatprep.subr.bf16.mxu1 %v3395_v20  ;;  %v818_v20 = vld [vmem:[%s4443_s11 + $0x80] sm:$0xff] }
 0x2eb   :  { %2813 = vmatpush1.bf16.msra.mxu1 %v3412_v25  ;;  %v819_v25 = vld [vmem:[%s4443_s11 + $0x88] sm:$0xff] }
 0x2ec   :  { %2815 = vmatprep.subr.bf16.mxu1 %v3415_v27  ;;  %v802_v27 = vld [vmem:[%s4443_s11] sm:$0xff] }
 0x2ef   :  { %2817 = vmatpush1.bf16.msra.mxu1 %v3432_v33  ;;  %v2842_v33 = vpack.c.bf16 %v819_v25, %v818_v20  ;;  %v833_v20 = vld [vmem:[%s4443_s11 + $0xf8] sm:$0xff]  ;;  %v816_v25 = vld [vmem:[%s4443_s11 + $0x70] sm:$0xff] }
 0x2f0   :  { %2819 = vmatprep.subr.bf16.mxu1 %v3435_v34  ;;  %v803_v34 = vld [vmem:[%s4443_s11 + $0x8] sm:$0xff] }
 0x2f1   :  { %2843 = vmatprep.subr.bf16.mxu0 %v2842_v33  ;;  %v817_v33 = vld [vmem:[%s4443_s11 + $0x78] sm:$0xff] }
 0x2f3   :  { %2821 = vmatpush1.bf16.msra.mxu1 %v3452_v41  ;;  %v820_v41 = vld [vmem:[%s4443_s11 + $0x90] sm:$0xff] }
 0x2f4   :  { %2823 = vmatprep.subr.bf16.mxu1 %v3455_v43  ;;  %v821_v43 = vld [vmem:[%s4443_s11 + $0x98] sm:$0xff] }
 0x2f7   :  { %2825 = vmatpush1.bf16.msra.mxu1 %v3472_v48  ;;  %v2844_v48 = vpack.c.bf16 %v803_v34, %v802_v27  ;;  %v2872_v34 = vpack.c.bf16 %v817_v33, %v816_v25 }
 0x2f8   :  { %2827 = vmatprep.subr.bf16.mxu1 %v3475_v50  ;;  %v2846_v50 = vpack.c.bf16 %v821_v43, %v820_v41  ;;  %v911_v41 = vld [vmem:[%s4445_s13 + $0x8] sm:$0xff]  ;;  %v913_v43 = vld [vmem:[%s4445_s13 + $0x18] sm:$0xff] }
 0x2fb   :  { %2829 = vmatpush1.bf16.msra.mxu1 %v3492_v57  ;;  %v804_v57 = vld [vmem:[%s4443_s11 + $0x10] sm:$0xff] }
 0x2fc   :  { %2831 = vmatprep.subr.bf16.mxu1 %v3495_v59  ;;  %v805_v59 = vld [vmem:[%s4443_s11 + $0x18] sm:$0xff] }
 0x2ff   :  { %2833 = vmatpush1.bf16.msra.mxu1 %v3512_v2  ;;  %v2848_v2 = vpack.c.bf16 %v805_v59, %v804_v57 }
 0x300   :  { %2835 = vmatprep.subr.bf16.mxu1 %v3515_v3 }
 0x303   :  { %2837 = vmatpush1.bf16.msra.mxu1 %v3535_v9 }
 0x304   :  { %2839 = vmatprep.subr.bf16.mxu1 %v3545_v12 }
 0x307   :  { %2841 = vmatpush1.bf16.msra.mxu1 %v3553_v17 }
 0x39d   :  { %v601_v42 = vpop.f32.mrb[4].mxu1 }
 0x39e   :  { %v602_v49 = vadd.f32 %v601_v42, %v528_v36  ;;  %v603_v51 = vpop.f32.mrb[5].mxu1  ;;  %v829_v42 = vld [vmem:[%s4443_s11 + $0xd8] sm:$0xff] }
 0x39f   :  { %v604_v56 = vadd.f32 %v603_v51, %v532_v39  ;;  %v812_v51 = vld [vmem:[%s4443_s11 + $0x50] sm:$0xff] }
 0x3a0   :  { %v612_v1 = vmax.f32 %v602_v49, 0.0 }
 0x3a1   :  { %v613_v58 = vmax.f32 %v604_v56, 0.0  ;;  %v607_v63 = vpop.f32.mrb[6].mxu1  ;;  %v813_v56 = vld [vmem:[%s4443_s11 + $0x58] sm:$0xff] }
 0x3a2   :  { %v608_v6 = vadd.f32 %v607_v63, %v528_v36  ;;  %v609_v8 = vpop.f32.mrb[7].mxu1  ;;  %v2860_v36 = vpack.c.bf16 %v811_v31, %v810_v62  ;;  %v830_v63 = vld [vmem:[%s4443_s11 + $0xe0] sm:$0xff] }
 0x3a3   :  { %v610_v13 = vadd.f32 %v609_v8, %v532_v39  ;;  %680 = vmatprep.mubr.f32.mxu0 %v613_v58  ;;  %v828_v39 = vld [vmem:[%s4443_s11 + $0xd0] sm:$0xff]  ;;  %v814_v8 = vld [vmem:[%s4443_s11 + $0x60] sm:$0xff] }
 0x3a4   :  { %681 = vmatmul.mubr.f32.vlgmr.msra.gmra.mrb[8].mxu0 %v612_v1  ;;  %v614_v19 = vmax.f32 %v608_v6, 0.0  ;;  %v2862_v49 = vpack.c.bf16 %v829_v42, %v828_v39  ;;  %v914_v39 = vld [vmem:[%s4445_s13 + $0x20] sm:$0xff]  ;;  %v916_v42 = vld [vmem:[%s4445_s13 + $0x30] sm:$0xff] }
 0x3a5   :  { %v615_v14 = vmax.f32 %v610_v13, 0.0  ;;  %2845 = vmatpush3.bf16.msra.mxu0 %v2844_v48  ;;  %v815_v13 = vld [vmem:[%s4443_s11 + $0x68] sm:$0xff]  ;;  %v2874_v48 = vpack.c.bf16 %v913_v43, %v911_v41  ;;  %v919_v41 = vld [vmem:[%s4447_s15] sm:$0x1] }
 0x3a6   :  { %2847 = vmatprep.subr.bf16.mxu0 %v2846_v50 }
 0x3a7   :  { %686 = vmatprep.mubr.f32.mxu0 %v615_v14 }
 0x3a8   :  { %687 = vmatmul.mubr.f32.gmra.mrb[10].mxu0 %v614_v19 }
 0x3a9   :  { %2849 = vmatpush3.bf16.msra.mxu0 %v2848_v2 }
 0x3aa   :  { %2851 = vmatprep.subr.bf16.mxu0 %v2850_v40 }
 0x3ad   :  { %2853 = vmatpush3.bf16.msra.mxu0 %v2852_v47 }
 0x3ae   :  { %2855 = vmatprep.subr.bf16.mxu0 %v2854_v46  ;;  %v794_v46 = vld [vmem:[%s4462_s10] sm:$0xff] }
 0x3b1   :  { %2857 = vmatpush3.bf16.msra.mxu0 %v2856_v23 }
 0x3b2   :  { %2859 = vmatprep.subr.bf16.mxu0 %v2858_v61  ;;  %v797_v61 = vld [vmem:[%s4462_s10 + $0x18] sm:$0xff] }
 0x3b5   :  { %2861 = vmatpush3.bf16.msra.mxu0 %v2860_v36 }
 0x3b6   :  { %2863 = vmatprep.subr.bf16.mxu0 %v2862_v49  ;;  %v2880_v49 = vpack.c.bf16 %v916_v42, %v914_v39 }
 0x477   :  { %v682_v3 = vpop.f32.mrb[8].mxu0 }
 0x478   :  { %v3932_v9 = vsub.f32 %v612_v1, %v682_v3  ;;  %v684_v12 = vpop.f32.mrb[9].mxu0  ;;  %v831_v1 = vld [vmem:[%s4443_s11 + $0xe8] sm:$0xff] }
 0x479   :  { %v3934_v17 = vsub.f32 %v613_v58, %v684_v12  ;;  %v2864_v58 = vpack.c.bf16 %v813_v56, %v812_v51  ;;  %v2866_v6 = vpack.c.bf16 %v831_v1, %v830_v63  ;;  %v4072_v51 = vld [vmem:[%s4463_s6] sm:$0x3] }
 0x47a   :  { %v697_v0 = vmul.f32 %v3932_v9, %v3932_v9  ;;  %v4076_v56 = vrot.slane %v4072_v51, %v3564_v22 }
 0x47b   :  { %v698_v35 = vmul.f32 %v3934_v17, %v3934_v17  ;;  %v688_v32 = vpop.f32.mrb[10].mxu0  ;;  %2865 = vmatpush3.bf16.msra.mxu0 %v2864_v58  ;;  %v4082_v58 = vrot.slane %v4072_v51, %v3570_v24 }
 0x47c   :  { %v3940_v4 = vsub.f32 %v614_v19, %v688_v32  ;;  %v690_v5 = vpop.f32.mrb[11].mxu0  ;;  %2867 = vmatprep.subr.bf16.mxu0 %v2866_v6  ;;  %v832_v19 = vld [vmem:[%s4443_s11 + $0xf0] sm:$0xff]  ;;  %s3061_s11 = smov 64  }
 0x47d   :  { %v3942_v10 = vsub.f32 %v615_v14, %v690_v5  ;;  %765 = vmatprep.mubr.f32.mxu1 %v698_v35  ;;  %v2868_v14 = vpack.c.bf16 %v815_v13, %v814_v8  ;;  %v2870_v27 = vpack.c.bf16 %v833_v20, %v832_v19  ;;  %1022 = vrot.lane.b32.xlu0 %v4076_v56, %s3061_s11  ;;  %v3062_v19 = vmov 1966171168  }
 0x47e   :  { %766 = vmatmul.mubr.f32.vlgmr.msra.gmra.mrb[8].mxu1 %v697_v0  ;;  %v699_v26 = vmul.f32 %v3940_v4, %v3940_v4  ;;  %v1296_v20 = vunpack.c.l.s4 %v3062_v19  ;;  %v4162_v19 = vld [vmem:[%s4466_s26] sm:$0xff] }
 0x47f   :  { %v700_v11 = vmul.f32 %v3942_v10, %v3942_v10  ;;  %2869 = vmatpush3.bf16.msra.mxu0 %v2868_v14  ;;  %vm69_vm6 = vcmp.ne.f32.partialorder %v4162_v19, 0.0 }
 0x480   :  { %2871 = vmatprep.subr.bf16.mxu0 %v2870_v27  ;;  %v1297_v25 = vunpack.c.0.s8 %v1296_v20  ;;  %v4167_v20 = vld [vmem:[%s4466_s26 + $0x8] sm:$0xff] }
 0x481   :  { %771 = vmatprep.mubr.f32.mxu1 %v700_v11  ;;  %1289 = vrot.lane.b32.xlu0 %v4082_v58, %s3061_s11  ;;  %vm70_vm4 = vcmp.ne.f32.partialorder %v4167_v20, 0.0 }
 0x482   :  { %772 = vmatmul.mubr.f32.gmra.mrb[10].mxu1 %v699_v26  ;;  %v1300_v27 = vsub.s32 %v1297_v25, %v3561_v21 }
 0x483   :  { %2873 = vmatpush3.bf16.msra.mxu0 %v2872_v34 }
 0x484   :  { %2875 = vmatprep.subr.bf16.mxu0 %v2874_v48  ;;  %v1301_v33 = vrot.slane %v4072_v51, %v1300_v27  ;;  %v918_v48 = vld [vmem:[%s4446_s14] sm:$0x3] }
 0x486   :  { %v1302_v34 = vcombine.high %v1301_v33, %v1301_v33 }
 0x488   :  { %v4092_v43 = vrot.slane %v1302_v34, %v1300_v27 }
 0x551   :  { %v767_v50 = vpop.f32.mrb[8].mxu1 }
 0x552   :  { %v768_v57 = vadd.f32 1e-05, %v767_v50  ;;  %v769_v59 = vpop.f32.mrb[9].mxu1  ;;  %v1027_v50 = vmul.f32 %v919_v41, %v4072_v51 }
 0x553   :  { %v770_v2 = vadd.f32 1e-05, %v769_v59  ;;  %v1311_v59 = vmul.f32 %v4092_v43, %v919_v41 }
 0x554   :  { %2981 = vrsqrt.f32 %v768_v57  ;;  %v924_v57 = vrot.slane %v918_v48, %v3564_v22 }
 0x555   :  { %2983 = vrsqrt.f32 %v770_v2  ;;  %v773_v3 = vpop.f32.mrb[10].mxu1  ;;  %v4100_v2 = vpop.permute.xlu0 %1022 }
 0x556   :  { %v774_v12 = vadd.f32 1e-05, %v773_v3  ;;  %v775_v35 = vpop.f32.mrb[11].mxu1  ;;  %v4103_v3 = vrot.slane %v1027_v50, %v3564_v22 }
 0x557   :  { %v776_v32 = vadd.f32 1e-05, %v775_v35 }
 0x558   :  { %2985 = vrsqrt.f32 %v774_v12 }
 0x559   :  { %2987 = vrsqrt.f32 %v776_v32 }
 0x55e   :  { %v2982_v0 = vpop.eup %2981 }
 0x55f   :  { %v2984_v5 = vpop.eup %2983  ;;  %v782_v11 = vmul.f32 %v2982_v0, %v3932_v9  ;;  %v910_v9 = vld [vmem:[%s4445_s13] sm:$0xff]  ;;  %v4106_v0 = vrot.slane %v1311_v59, %v3564_v22 }
 0x560   :  { %v783_v26 = vmul.f32 %v2984_v5, %v3934_v17  ;;  %v912_v17 = vld [vmem:[%s4445_s13 + $0x10] sm:$0xff] }
 0x561   :  { %v786_v28 = vmul.f32 %v782_v11, %v3849_v16  ;;  %v2876_v55 = vpack.c.bf16 %v912_v17, %v910_v9 }
 0x562   :  { %v2986_v30 = vpop.eup %2985  ;;  %v787_v40 = vmul.f32 %v783_v26, %v3852_v29 }
 0x563   :  { %v2988_v37 = vpop.eup %2987  ;;  %v790_v47 = vadd.f32 %v786_v28, %v3860_v44  ;;  %v784_v52 = vmul.f32 %v2986_v30, %v3940_v4  ;;  %v4111_v28 = vpop.permute.xlu0 %1289 }
 0x564   :  { %v791_v53 = vadd.f32 %v787_v40, %v3857_v38  ;;  %v785_v54 = vmul.f32 %v2988_v37, %v3942_v10  ;;  %v796_v10 = vld [vmem:[%s4462_s10 + $0x10] sm:$0xff] }
 0x565   :  { %v788_v15 = vmul.f32 %v784_v52, %v3849_v16  ;;  %v798_v60 = vmul.f32 %v794_v46, %v790_v47 }
 0x566   :  { %v799_v23 = vmul.f32 %v795_v45, %v791_v53  ;;  %v789_v4 = vmul.f32 %v785_v54, %v3852_v29  ;;  %v915_v29 = vld [vmem:[%s4445_s13 + $0x28] sm:$0xff] }
 0x567   :  { %v792_v62 = vadd.f32 %v788_v15, %v3860_v44 }
 0x568   :  { %898 = vmatprep.mubr.f32.mxu0 %v799_v23  ;;  %v793_v31 = vadd.f32 %v789_v4, %v3857_v38  ;;  %v917_v38 = vld [vmem:[%s4445_s13 + $0x38] sm:$0xff] }
 0x569   :  { %899 = vmatmul.mubr.f32.vlgmr.msra.gmra.mrb[12].mxu0 %v798_v60  ;;  %v800_v36 = vmul.f32 %v796_v10, %v792_v62  ;;  %v2878_v44 = vpack.c.bf16 %v917_v38, %v915_v29 }
 0x56a   :  { %v801_v16 = vmul.f32 %v797_v61, %v793_v31  ;;  %2877 = vmatpush1.bf16.msra.mxu0 %v2876_v55  ;;  %v928_v61 = vrot.slane %v918_v48, %v3570_v24 }
 0x56b   :  { %2879 = vmatprep.subr.bf16.mxu0 %v2878_v44 }
 0x56c   :  { %903 = vmatprep.mubr.f32.mxu0 %v801_v16 }
 0x56d   :  { %904 = vmatmul.mubr.f32.gmra.mrb[14].mxu0 %v800_v36 }
 0x56e   :  { %1002 = vmatprep.mubr.f32.mxu0 %v3060_v7  ;;  %2881 = vmatpush1.bf16.msra.mxu0 %v2880_v49 }
 0x63c   :  { %v2398_v63 = vpop.f32.mrb[12].mxu0 }
 0x63d   :  { %v2399_v1 = vpop.f32.mrb[13].mxu0 }
 0x63e   :  { %v2400_v6 = vadd.f32 %v2399_v1, %v2398_v63 }
 0x640   :  { %v2401_v8 = vpop.f32.mrb[14].mxu0  ;;  %2322 = vmatmul.mubr.msk.f32.vlgmr.msra.gmra.mrb[16].mxu0 %vm931_vm1, %v2400_v6 }
 0x641   :  { %v2402_v13 = vpop.f32.mrb[15].mxu0  ;;  %1008 = vmatprep.mubr.f32.mxu0 %v3060_v7 }
 0x642   :  { %v2403_v14 = vadd.f32 %v2402_v13, %v2401_v8 }
 0x644   :  { %2323 = vmatmul.mubr.msk.f32.gmra.mrb[18].mxu0 %vm931_vm1, %v2403_v14 }
 0x713   :  { %v1004_v12 = vpop.f32.mrb[16].mxu0 }
 0x714   :  { %v1005_v35 = vadd.f32 %v1004_v12, %v924_v57  ;;  %v1006_v32 = vpop.f32.mrb[17].mxu0 }
 0x715   :  { %v4137_v29 = vadd.f32 %v1006_v32, %v928_v61 }
 0x716   :  { %v1019_v5 = vmul.f32 %v4076_v56, %v1005_v35  ;;  %v1286_v11 = vmul.f32 %v4082_v58, %v1005_v35  ;;  %v1034_v26 = vmul.f32 %v4103_v3, %v1005_v35  ;;  %v1318_v47 = vmul.f32 %v4106_v0, %v1005_v35 }
 0x717   :  { %v1010_v30 = vpop.f32.mrb[18].mxu0  ;;  %v1292_v52 = vmul.f32 %v4111_v28, %v1005_v35  ;;  %v1025_v9 = vmul.f32 %v4100_v2, %v1005_v35 }
 0x718   :  { %v1011_v40 = vadd.f32 %v1010_v30, %v924_v57  ;;  %v1012_v37 = vpop.f32.mrb[19].mxu0  ;;  %2443 = vmatprep.mubr.msk.f32.mxu0 %vm1036_vm2, %v1019_v5  ;;  %2457 = vmatprep.mubr.msk.f32.mxu1 %vm1036_vm2, %v1286_v11  ;;  %v1037_v45 = vsel %vm1036_vm2, %v1034_v26, 0.0  ;;  %v1320_v46 = vsel %vm1036_vm2, %v1318_v47, 0.0 }
 0x719   :  { %1038 = vadd.xlane.f32.xlu0 %v1037_v45  ;;  %v4129_v31 = vadd.f32 %v1012_v37, %v928_v61 }
 0x71a   :  { %v1026_v17 = vmul.f32 %v4100_v2, %v1011_v40  ;;  %v1293_v53 = vmul.f32 %v4111_v28, %v1011_v40  ;;  %v1319_v15 = vmul.f32 %v4106_v0, %v1011_v40  ;;  %v1035_v55 = vmul.f32 %v4103_v3, %v1011_v40 }
 0x71b   :  { %v4141_v39 = vpack.c.bf16 %v4129_v31, %v4137_v29  ;;  %v1020_v1 = vmul.f32 %v4076_v56, %v1011_v40  ;;  %v1287_v6 = vmul.f32 %v4082_v58, %v1011_v40 }
 0x71c   :  { %v2948_v54 = vpack.i.bf16 %v1026_v17, %v1025_v9  ;;  %v2953_v23 = vpack.i.bf16 %v1293_v53, %v1292_v52  ;;  %v1323_v4 = vsel %vm1036_vm2, %v1319_v15, 0.0  ;;  %v1040_v60 = vsel %vm1036_vm2, %v1035_v55, 0.0 }
 0x71d   :  { %1321 = vadd.xlane.f32.xlu0 %v1320_v46 }
 0x71e   :  { %2949 = vrot.lane.b32.xlu1 %v2948_v54, %s3061_s11 }
 0x721   :  { %1324 = vadd.xlane.f32.xlu0 %v1323_v4 }
 0x722   :  { %2954 = vrot.lane.b32.xlu1 %v2953_v23, %s3061_s11 }
 0x746   :  { %1041 = vadd.xlane.f32.xlu1 %v1040_v60 }
 0x790   :  { %v2950_v62 = vpop.permute.xlu1 %2949 }
 0x791   :  { %v2952_v10 = vunpack.i.h.bf16 %v2950_v62  ;;  %v2951_v16 = vunpack.i.l.bf16 %v2950_v62 }
 0x793   :  { %v2882_v38 = vpack.c.bf16 %v2952_v10, %v2951_v16 }
 0x794   :  { %v2955_v44 = vpop.permute.xlu1 %2954 }
 0x795   :  { %v2957_v42 = vunpack.i.h.bf16 %v2955_v44  ;;  %v2956_v49 = vunpack.i.l.bf16 %v2955_v44  ;;  %2884 = vmatprep.subr.msk.bf16.mxu0 %vm4133_vm3, %v2882_v38 }
 0x796   :  { %2887 = vmatpush3.bf16.xpose.msk.msra.mxu0 %vm4133_vm3, %v2882_v38 }
 0x797   :  { %v2892_v63 = vpack.c.bf16 %v2957_v42, %v2956_v49  ;;  %2889 = vmatprep.subr.bf16.mxu0 %v4141_v39 }
 0x799   :  { %2894 = vmatprep.subr.msk.bf16.mxu1 %vm4133_vm3, %v2892_v63 }
 0x79a   :  { %2897 = vmatpush3.bf16.xpose.msk.msra.mxu1 %vm4133_vm3, %v2892_v63 }
 0x79d   :  { %2444 = vmatmul.mubr.msk.f32.vlgmr.msra.gmra.mrb[20].mxu0 %vm1036_vm2, %v1020_v1 }
 0x79e   :  { %2891 = vmatpush3.bf16.msra.mxu0 %v4141_v39 }
 0x79f   :  { %2899 = vmatprep.subr.bf16.mxu0 %v4141_v39 }
 0x7a1   :  { %2458 = vmatmul.mubr.msk.f32.vlgmr.msra.gmra.mrb[12].mxu1 %vm1036_vm2, %v1287_v6 }
 0x7a2   :  { %1669 = vmatprep.mubr.f32.mxu1 %v3060_v7 }
 0x7a6   :  { %v1039_v8 = vpop.xlane.xlu0 %1038 }
 0x7a7   :  { %v1043_v27 = vmul.f32 %v1039_v8, %v4162_v19 }
 0x7aa   :  { %v1322_v13 = vpop.xlane.xlu0 %1321 }
 0x7ab   :  { %v1326_v12 = vmul.f32 %v1322_v13, %v4162_v19 }
 0x7ae   :  { %v1325_v33 = vpop.xlane.xlu0 %1324 }
 0x7af   :  { %v1327_v57 = vmul.f32 %v1325_v33, %v4167_v20 }
 0x7d3   :  { %v1042_v14 = vpop.xlane.xlu1 %1041 }
 0x7d4   :  { %v1044_v25 = vmul.f32 %v1042_v14, %v4167_v20 }
 0x870   :  { %v2445_v34 = vpop.f32.mrb[20].mxu0 }
 0x871   :  { %v1133_v41 = vadd.f32 %v2445_v34, %v1044_v25  ;;  %v1127_v48 = vpop.f32.mrb[21].mxu0 }
 0x872   :  { %v1128_v50 = vadd.f32 %v1127_v48, %v1043_v27 }
 0x873   :  { %v1137_v59 = vmul.f32 0.17677669, %v1133_v41 }
 0x874   :  { %v1136_v35 = vmul.f32 0.17677669, %v1128_v50  ;;  %v2459_v32 = vpop.f32.mrb[12].mxu1 }
 0x875   :  { %v1416_v5 = vadd.f32 %v2459_v32, %v1327_v57  ;;  %v1410_v11 = vpop.f32.mrb[13].mxu1  ;;  %v1139_v26 = vsel %vm70_vm4, %v1137_v59, -1e+30 }
 0x876   :  { %v1411_v30 = vadd.f32 %v1410_v11, %v1326_v12  ;;  %v1144_v40 = vsel %vm1140_vm5, %v1139_v26, -inf  ;;  %v1138_v37 = vsel %vm69_vm6, %v1136_v35, -1e+30 }
 0x877   :  { %v1420_v45 = vmul.f32 0.17677669, %v1416_v5  ;;  %1145 = vmax.xlane.f32.xlu0 %v1144_v40  ;;  %v1141_v47 = vsel %vm1140_vm5, %v1138_v37, -inf }
 0x878   :  { %v1419_v52 = vmul.f32 0.17677669, %v1411_v30  ;;  %1142 = vmax.xlane.f32.xlu1 %v1141_v47 }
 0x879   :  { %v1422_v9 = vsel %vm70_vm4, %v1420_v45, -1e+30 }
 0x87a   :  { %v1426_v17 = vsel %vm1140_vm5, %v1422_v9, -inf  ;;  %v1421_v53 = vsel %vm69_vm6, %v1419_v52, -1e+30 }
 0x87b   :  { %1427 = vmax.xlane.f32.xlu0 %v1426_v17  ;;  %v1423_v46 = vsel %vm1140_vm5, %v1421_v53, -inf }
 0x87c   :  { %1424 = vmax.xlane.f32.xlu1 %v1423_v46 }
 0x904   :  { %v1146_v54 = vpop.xlane.xlu0 %1145 }
 0x905   :  { %v1148_v15 = vsub.f32 %v1139_v26, %v1146_v54  ;;  %v1143_v23 = vpop.xlane.xlu1 %1142 }
 0x906   :  { %v1147_v4 = vsub.f32 %v1138_v37, %v1143_v23 }
 0x907   :  { %v1151_v55 = vmul.f32 1.442695, %v1148_v15 }
 0x908   :  { %v1149_v60 = vmul.f32 1.442695, %v1147_v4  ;;  %v1428_v61 = vpop.xlane.xlu0 %1427 }
 0x909   :  { %2989 = vpow2.f32 %v1151_v55  ;;  %v1430_v62 = vsub.f32 %v1422_v9, %v1428_v61  ;;  %v1425_v10 = vpop.xlane.xlu1 %1424 }
 0x90a   :  { %2991 = vpow2.f32 %v1149_v60  ;;  %v1429_v16 = vsub.f32 %v1421_v53, %v1425_v10 }
 0x90b   :  { %v1433_v38 = vmul.f32 1.442695, %v1430_v62 }
 0x90c   :  { %v1431_v44 = vmul.f32 1.442695, %v1429_v16 }
 0x90d   :  { %2993 = vpow2.f32 %v1433_v38 }
 0x90e   :  { %2995 = vpow2.f32 %v1431_v44 }
 0x913   :  { %v2990_v42 = vpop.eup %2989 }
 0x914   :  { %v2992_v49 = vpop.eup %2991  ;;  %v1154_v63 = vsel %vm70_vm4, %v2990_v42, 0.0 }
 0x915   :  { %v1158_v1 = vsel %vm1140_vm5, %v1154_v63, 0.0  ;;  %v1153_v6 = vsel %vm69_vm6, %v2992_v49, 0.0 }
 0x916   :  { %1159 = vadd.xlane.f32.xlu0 %v1158_v1  ;;  %v1155_v8 = vsel %vm1140_vm5, %v1153_v6, 0.0  ;;  %v1569_v1 = vld [vmem:[%s4448_s16 + $0x18] sm:$0xff] }
 0x917   :  { %v2994_v13 = vpop.eup %2993  ;;  %1156 = vadd.xlane.f32.xlu1 %v1155_v8 }
 0x918   :  { %v2996_v14 = vpop.eup %2995  ;;  %v1436_v25 = vsel %vm70_vm4, %v2994_v13, 0.0  ;;  %v1568_v13 = vld [vmem:[%s4448_s16 + $0x10] sm:$0xff] }
 0x919   :  { %v1440_v27 = vsel %vm1140_vm5, %v1436_v25, 0.0  ;;  %v1435_v33 = vsel %vm69_vm6, %v2996_v14, 0.0  ;;  %v1571_v14 = vld [vmem:[%s4448_s16 + $0x28] sm:$0xff] }
 0x91a   :  { %1441 = vadd.xlane.f32.xlu0 %v1440_v27  ;;  %v1437_v34 = vsel %vm1140_vm5, %v1435_v33, 0.0 }
 0x91b   :  { %1438 = vadd.xlane.f32.xlu1 %v1437_v34  ;;  %v1570_v34 = vld [vmem:[%s4448_s16 + $0x20] sm:$0xff] }
 0x9a3   :  { %v1160_v41 = vpop.xlane.xlu0 %1159 }
 0x9a4   :  { %vm1162_vm7 = vcmp.gt.f32.partialorder %v1160_v41, 0.0  ;;  %v1157_v48 = vpop.xlane.xlu1 %1156 }
 0x9a5   :  { %v1164_v50 = vsel %vm1162_vm7, %v1160_v41, 1.0  ;;  %vm1161_vm8 = vcmp.gt.f32.partialorder %v1157_v48, 0.0  ;;  %v1572_v41 = vld [vmem:[%s4448_s16 + $0x30] sm:$0xff]  ;;  %vm2304_vm7 = vcmask 517120  }
 0x9a6   :  { %2997 = vrcp.f32 %v1164_v50  ;;  %v1163_v57 = vsel %vm1161_vm8, %v1157_v48, 1.0  ;;  %v1575_v48 = vld [vmem:[%s4448_s16 + $0x48] sm:$0xff] }
 0x9a7   :  { %2999 = vrcp.f32 %v1163_v57  ;;  %v1442_v59 = vpop.xlane.xlu0 %1441  ;;  %v1577_v57 = vld [vmem:[%s4448_s16 + $0x58] sm:$0xff] }
 0x9a8   :  { %vm1444_vm9 = vcmp.gt.f32.partialorder %v1442_v59, 0.0  ;;  %v1439_v12 = vpop.xlane.xlu1 %1438 }
 0x9a9   :  { %v1446_v35 = vsel %vm1444_vm9, %v1442_v59, 1.0  ;;  %vm1443_vm10 = vcmp.gt.f32.partialorder %v1439_v12, 0.0 }
 0x9aa   :  { %3001 = vrcp.f32 %v1446_v35  ;;  %v1445_v32 = vsel %vm1443_vm10, %v1439_v12, 1.0  ;;  %v2908_v12 = vpack.c.bf16 %v1572_v41, %v1570_v34  ;;  %v2910_v35 = vpack.c.bf16 %v1577_v57, %v1575_v48 }
 0x9ab   :  { %3003 = vrcp.f32 %v1445_v32  ;;  %v1574_v32 = vld [vmem:[%s4448_s16 + $0x40] sm:$0xff] }
 0x9b0   :  { %v2998_v5 = vpop.eup %2997 }
 0x9b1   :  { %v3000_v11 = vpop.eup %2999  ;;  %v1168_v26 = vmul.f32 %v2998_v5, %v1154_v63  ;;  %v1567_v63 = vld [vmem:[%s4448_s16 + $0x8] sm:$0xff]  ;;  %v1576_v5 = vld [vmem:[%s4448_s16 + $0x50] sm:$0xff] }
 0x9b2   :  { %v1166_v30 = vmul.f32 %v3000_v11, %v1153_v6  ;;  %v1566_v6 = vld [vmem:[%s4448_s16] sm:$0xff]  ;;  %v2902_v8 = vpack.c.bf16 %v1569_v1, %v1567_v63  ;;  %v1579_v11 = vld [vmem:[%s4448_s16 + $0x68] sm:$0xff] }
 0x9b3   :  { %v1170_v40 = vmul.f32 %v1168_v26, %v4167_v20  ;;  %v2904_v27 = vpack.c.bf16 %v1568_v13, %v1566_v6 }
 0x9b4   :  { %v3002_v37 = vpop.eup %3001  ;;  %2450 = vmatprep.mubr.msk.f32.mxu0 %vm1140_vm5, %v1166_v30  ;;  %v1169_v45 = vmul.f32 %v1166_v30, %v4162_v19  ;;  %2903 = vmatprep.subr.bf16.mxu1 %v2902_v8 }
 0x9b5   :  { %v3004_v47 = vpop.eup %3003  ;;  %2451 = vmatmul.mubr.msk.f32.vlgmr.msra.gmra.mrb[22].mxu0 %vm1140_vm5, %v1168_v26  ;;  %v1174_v52 = vsel %vm1140_vm5, %v1170_v40, 0.0  ;;  %v1450_v9 = vmul.f32 %v3002_v37, %v1436_v25  ;;  %v1573_v25 = vld [vmem:[%s4448_s16 + $0x38] sm:$0xff]  ;;  %2905 = vmatpush1.bf16.msra.mxu1 %v2904_v27  ;;  %v2912_v40 = vpack.c.bf16 %v1576_v5, %v1574_v32 }
 0x9b6   :  { %2901 = vmatpush3.bf16.msra.mxu0 %v4141_v39  ;;  %1175 = vadd.xlane.f32.xlu0 %v1174_v52  ;;  %v1171_v17 = vsel %vm1140_vm5, %v1169_v45, 0.0  ;;  %v1448_v53 = vmul.f32 %v3004_v47, %v1435_v33  ;;  %v2906_v33 = vpack.c.bf16 %v1573_v25, %v1571_v14  ;;  %v1581_v26 = vld [vmem:[%s4448_s16 + $0x78] sm:$0xff]  ;;  %v1578_v45 = vld [vmem:[%s4448_s16 + $0x60] sm:$0xff]  ;;  %v1580_v47 = vld [vmem:[%s4448_s16 + $0x70] sm:$0xff] }
 0x9b7   :  { %1172 = vadd.xlane.f32.xlu1 %v1171_v17  ;;  %v1452_v46 = vmul.f32 %v1450_v9, %v4167_v20  ;;  %v2914_v37 = vpack.c.bf16 %v1581_v26, %v1579_v11  ;;  %v2916_v52 = vpack.c.bf16 %v1580_v47, %v1578_v45 }
 0x9b8   :  { %2464 = vmatprep.mubr.msk.f32.mxu0 %vm1140_vm5, %v1448_v53  ;;  %v1451_v54 = vmul.f32 %v1448_v53, %v4162_v19  ;;  %2907 = vmatprep.subr.bf16.mxu1 %v2906_v33 }
 0x9b9   :  { %2465 = vmatmul.mubr.msk.f32.vlgmr.msra.gmra.mrb[24].mxu0 %vm1140_vm5, %v1450_v9  ;;  %v1456_v15 = vsel %vm1140_vm5, %v1452_v46, 0.0  ;;  %2909 = vmatpush1.bf16.msra.mxu1 %v2908_v12 }
 0x9ba   :  { %1457 = vadd.xlane.f32.xlu0 %v1456_v15  ;;  %v1453_v23 = vsel %vm1140_vm5, %v1451_v54, 0.0  ;;  %2911 = vmatprep.subr.bf16.mxu1 %v2910_v35 }
 0x9bb   :  { %1454 = vadd.xlane.f32.xlu1 %v1453_v23 }
 0x9bd   :  { %2913 = vmatpush1.bf16.msra.mxu1 %v2912_v40 }
 0x9be   :  { %2915 = vmatprep.subr.bf16.mxu1 %v2914_v37 }
 0x9c1   :  { %2917 = vmatpush1.bf16.msra.mxu1 %v2916_v52 }
 0xa43   :  { %v1176_v55 = vpop.xlane.xlu0 %1175 }
 0xa44   :  { %v1173_v39 = vpop.xlane.xlu1 %1172  ;;  %v1271_v60 = vmul.f32 %v1176_v55, %v4103_v3 }
 0xa45   :  { %v1270_v4 = vmul.f32 %v1173_v39, %v4103_v3 }
 0xa47   :  { %1274 = vrot.lane.b32.xlu0 %v1270_v4, %s3061_s11  ;;  %v1458_v59 = vpop.xlane.xlu0 %1457 }
 0xa48   :  { %v1455_v49 = vpop.xlane.xlu1 %1454  ;;  %v1553_v30 = vmul.f32 %v1458_v59, %v4106_v0 }
 0xa49   :  { %v1552_v50 = vmul.f32 %v1455_v49, %v4106_v0 }
 0xa4b   :  { %1276 = vrot.lane.b32.xlu0 %v1271_v60, %s3061_s11 }
 0xa88   :  { %v2452_v61 = vpop.f32.mrb[22].mxu0 }
 0xa89   :  { %v1259_v62 = vmul.f32 %v2452_v61, %v4076_v56  ;;  %v1249_v10 = vpop.f32.mrb[23].mxu0 }
 0xa8a   :  { %v1258_v38 = vmul.f32 %v1249_v10, %v4076_v56 }
 0xa8b   :  { %1264 = vrot.lane.b32.xlu1 %v1259_v62, %s3061_s11 }
 0xa8c   :  { %v2466_v16 = vpop.f32.mrb[24].mxu0 }
 0xa8d   :  { %v1541_v44 = vmul.f32 %v2466_v16, %v4082_v58  ;;  %v1531_v42 = vpop.f32.mrb[25].mxu0 }
 0xa8e   :  { %v1540_v3 = vmul.f32 %v1531_v42, %v4082_v58  ;;  %v4286_v42 = vld [vmem:[%s4450_s18] sm:$0x1]  ;;  %s2355_s18 = sld [smem:[#allocation3 + $0x1]] }
 0xa8f   :  { %1262 = vrot.lane.b32.xlu1 %v1258_v38, %s3061_s11  ;;  %1546 = vrot.lane.b32.xlu0 %v1541_v44, %s3061_s11  ;;  %v1686_v49 = vmul.f32 %v4286_v42, %v4072_v51 }
 0xa91   :  { %v4295_v1 = vrot.slane %v1686_v49, %v3564_v22 }
 0xa93   :  { %1544 = vrot.lane.b32.xlu1 %v1540_v3, %s3061_s11  ;;  %v1582_v3 = vld [vmem:[%s4449_s17] sm:$0x3]  ;;  %s2202_s17 = sld [smem:[#allocation3]] }
 0xa94   :  { %v1588_v63 = vrot.slane %v1582_v3, %v3564_v22  ;;  %v1592_v14 = vrot.slane %v1582_v3, %v3570_v24  ;;  %p2213_p6 = scmp.gt.s32.totalorder %s2355_s18, 0  ;;  %p2356_p8 = scmp.lt.s32.totalorder %s2355_s18, 7 }
 0xa96   :  { %s4468_s18 = smov (!%p2213_p6, %s2355_s18), 0 }
 0xa97   :  { %1556 = vrot.lane.b32.xlu1 %v1552_v50, %s3061_s11  ;;  %s4472_s18 = smov (!%p2356_p8, %s4468_s18), 7 }
 0xa98   :  { %s2218_s23 = sadd.s32 8, %s4472_s18 }
 0xa99   :  { %p2203_p5 = scmp.gt.s32.totalorder %s2202_s17, 0  ;;  %p2350_p7 = scmp.lt.s32.totalorder %s2202_s17, 7 }
 0xa9b   :  { %1558 = vrot.lane.b32.xlu1 %v1553_v30, %s3061_s11  ;;  %s2204_s2 = scalar_select %p2203_p5, %s2202_s17, 0 }
 0xa9d   :  { %s4470_s2 = smov (!%p2350_p7, %s2204_s2), 7 }
 0xab9   :  { %v1275_v0 = vpop.permute.xlu0 %1274 }
 0xabd   :  { %v1277_v15 = vpop.permute.xlu0 %1276 }
 0xafd   :  { %v1265_v9 = vpop.permute.xlu1 %1264 }
 0xafe   :  { %v1269_v46 = vadd.f32 %v1265_v9, %v4129_v31 }
 0xb00   :  { %v1281_v39 = vadd.f32 %v1277_v15, %v1269_v46 }
 0xb01   :  { %v1263_v17 = vpop.permute.xlu1 %1262  ;;  %v1547_v55 = vpop.permute.xlu0 %1546 }
 0xb02   :  { %v1268_v53 = vadd.f32 %v1263_v17, %v4137_v29  ;;  %v1551_v62 = vadd.f32 %v1547_v55, %v1281_v39 }
 0xb04   :  { %v1280_v54 = vadd.f32 %v1275_v0, %v1268_v53 }
 0xb05   :  { %v1545_v23 = vpop.permute.xlu1 %1544 }
 0xb06   :  { %v1550_v4 = vadd.f32 %v1545_v23, %v1280_v54 }
 0xb09   :  { %v1557_v60 = vpop.permute.xlu1 %1556 }
 0xb0a   :  { %v1562_v61 = vadd.f32 %v1557_v60, %v1550_v4 }
 0xb0c   :  { %v1564_v10 = vmax.f32 %v1562_v61, 0.0 }
 0xb0d   :  { %v1559_v16 = vpop.permute.xlu1 %1558 }
 0xb0e   :  { %v1563_v38 = vadd.f32 %v1559_v16, %v1551_v62  ;;  %1597 = vrot.lane.b32.xlu0 %v1564_v10, %s3061_s11 }
 0xb10   :  { %v1565_v44 = vmax.f32 %v1563_v38, 0.0 }
 0xb12   :  { %1599 = vrot.lane.b32.xlu1 %v1565_v44, %s3061_s11  ;;  %v1943_v44 = vmul.f32 %v4286_v42, %v4092_v43 }
 0xb80   :  { %v1598_v29 = vpop.permute.xlu0 %1597 }
 0xb81   :  { %2336 = vmatmul.mubr.msk.f32.vlgmr.msra.gmra.mrb[14].mxu1 %vm1036_vm2, %v1598_v29  ;;  %v4344_v29 = vrot.slane %v1943_v44, %v3564_v22 }
 0xb82   :  { %1675 = vmatprep.mubr.f32.mxu1 %v3060_v7 }
 0xb84   :  { %v1600_v31 = vpop.permute.xlu1 %1599 }
 0xb85   :  { %2337 = vmatmul.mubr.msk.f32.gmra.mrb[16].mxu1 %vm1036_vm2, %v1600_v31 }
 0xc54   :  { %v1671_v6 = vpop.f32.mrb[14].mxu1 }
 0xc55   :  { %v4297_v8 = vadd.f32 %v1671_v6, %v1588_v63  ;;  %v1673_v13 = vpop.f32.mrb[15].mxu1 }
 0xc56   :  { %v4308_v48 = vadd.f32 %v1673_v13, %v1592_v14 }
 0xc57   :  { %v1682_v25 = vmul.f32 %v4297_v8, %v4076_v56  ;;  %v1693_v27 = vmul.f32 %v4295_v1, %v4297_v8  ;;  %v1684_v24 = vmul.f32 %v4297_v8, %v4100_v2  ;;  %v1941_v12 = vmul.f32 %v4297_v8, %v4111_v28 }
 0xc58   :  { %v1677_v33 = vpop.f32.mrb[16].mxu1  ;;  %v1950_v13 = vmul.f32 %v4344_v29, %v4297_v8 }
 0xc59   :  { %v4304_v34 = vadd.f32 %v1677_v33, %v1588_v63  ;;  %v1679_v51 = vpop.f32.mrb[17].mxu1  ;;  %2471 = vmatprep.mubr.msk.f32.mxu0 %vm1036_vm2, %v1682_v25  ;;  %v1695_v41 = vsel %vm1036_vm2, %v1693_v27, 0.0 }
 0xc5a   :  { %v4310_v50 = vadd.f32 %v1679_v51, %v1592_v14  ;;  %1696 = vadd.xlane.f32.xlu1 %v1695_v41  ;;  %v1952_v22 = vsel %vm1036_vm2, %v1950_v13, 0.0 }
 0xc5b   :  { %v1685_v57 = vmul.f32 %v4304_v34, %v4100_v2  ;;  %v1942_v35 = vmul.f32 %v4304_v34, %v4111_v28  ;;  %v1694_v11 = vmul.f32 %v4295_v1, %v4304_v34  ;;  %v1683_v28 = vmul.f32 %v4304_v34, %v4076_v56 }
 0xc5c   :  { %v2924_v59 = vpack.c.bf16 %v4310_v50, %v4308_v48  ;;  %v1951_v43 = vmul.f32 %v4344_v29, %v4304_v34 }
 0xc5d   :  { %v2958_v32 = vpack.i.bf16 %v1685_v57, %v1684_v24  ;;  %v2963_v5 = vpack.i.bf16 %v1942_v35, %v1941_v12  ;;  %v1698_v2 = vsel %vm1036_vm2, %v1694_v11, 0.0 }
 0xc5e   :  { %2935 = vmatprep.subr.bf16.mxu1 %v2924_v59  ;;  %v1955_v42 = vsel %vm1036_vm2, %v1951_v43, 0.0 }
 0xc5f   :  { %2937 = vmatpush3.bf16.msra.mxu1 %v2924_v59  ;;  %2959 = vrot.lane.b32.xlu0 %v2958_v32, %s3061_s11 }
 0xc7e   :  { %1699 = vadd.xlane.f32.xlu0 %v1698_v2 }
 0xcd1   :  { %v2960_v26 = vpop.permute.xlu0 %2959 }
 0xcd2   :  { %v2962_v30 = vunpack.i.h.bf16 %v2960_v26  ;;  %v2961_v40 = vunpack.i.l.bf16 %v2960_v26 }
 0xcd4   :  { %v2918_v37 = vpack.c.bf16 %v2962_v30, %v2961_v40  ;;  %v1940_v30 = vmul.f32 %v4304_v34, %v4082_v58 }
 0xcd6   :  { %2920 = vmatprep.subr.msk.bf16.mxu0 %vm4133_vm3, %v2918_v37 }
 0xcd7   :  { %2923 = vmatpush3.bf16.xpose.msk.msra.mxu0 %vm4133_vm3, %v2918_v37 }
 0xcd8   :  { %2925 = vmatprep.subr.bf16.mxu0 %v2924_v59 }
 0xcde   :  { %2472 = vmatmul.mubr.msk.f32.vlgmr.msra.gmra.mrb[26].mxu0 %vm1036_vm2, %v1683_v28 }
 0xcdf   :  { %2927 = vmatpush3.bf16.msra.mxu0 %v2924_v59 }
 0xce7   :  { %v1697_v47 = vpop.xlane.xlu1 %1696 }
 0xce8   :  { %v1701_v9 = vmul.f32 %v1697_v47, %v4162_v19 }
 0xd0b   :  { %v1700_v45 = vpop.xlane.xlu0 %1699 }
 0xd0c   :  { %v1702_v52 = vmul.f32 %v1700_v45, %v4167_v20 }
 0xdb1   :  { %v2473_v0 = vpop.f32.mrb[26].mxu0 }
 0xdb2   :  { %v1791_v17 = vadd.f32 %v2473_v0, %v1702_v52  ;;  %v1785_v53 = vpop.f32.mrb[27].mxu0 }
 0xdb3   :  { %v1786_v46 = vadd.f32 %v1785_v53, %v1701_v9 }
 0xdb4   :  { %v1795_v54 = vmul.f32 0.17677669, %v1791_v17 }
 0xdb5   :  { %v1794_v15 = vmul.f32 0.17677669, %v1786_v46 }
 0xdb6   :  { %v1797_v23 = vsel %vm70_vm4, %v1795_v54, -1e+30 }
 0xdb7   :  { %v1801_v39 = vsel %vm1140_vm5, %v1797_v23, -inf  ;;  %v1796_v4 = vsel %vm69_vm6, %v1794_v15, -1e+30 }
 0xdb8   :  { %1802 = vmax.xlane.f32.xlu1 %v1801_v39  ;;  %v1798_v55 = vsel %vm1140_vm5, %v1796_v4, -inf }
 0xdb9   :  { %1799 = vmax.xlane.f32.xlu0 %v1798_v55 }
 0xe45   :  { %v1803_v60 = vpop.xlane.xlu1 %1802 }
 0xe46   :  { %v1805_v61 = vsub.f32 %v1797_v23, %v1803_v60  ;;  %v1800_v62 = vpop.xlane.xlu0 %1799 }
 0xe47   :  { %v1804_v10 = vsub.f32 %v1796_v4, %v1800_v62 }
 0xe48   :  { %v1808_v16 = vmul.f32 1.442695, %v1805_v61 }
 0xe49   :  { %v1806_v38 = vmul.f32 1.442695, %v1804_v10 }
 0xe4a   :  { %3005 = vpow2.f32 %v1808_v16 }
 0xe4b   :  { %3007 = vpow2.f32 %v1806_v38 }
 0xe54   :  { %v3006_v31 = vpop.eup %3005 }
 0xe55   :  { %v3008_v3 = vpop.eup %3007  ;;  %v1811_v49 = vsel %vm70_vm4, %v3006_v31, 0.0 }
 0xe56   :  { %v1815_v63 = vsel %vm1140_vm5, %v1811_v49, 0.0  ;;  %v1810_v6 = vsel %vm69_vm6, %v3008_v3, 0.0 }
 0xe57   :  { %1816 = vadd.xlane.f32.xlu1 %v1815_v63  ;;  %v1812_v14 = vsel %vm1140_vm5, %v1810_v6, 0.0 }
 0xe58   :  { %1813 = vadd.xlane.f32.xlu0 %v1812_v14 }
 0xe5b   :  { %1953 = vadd.xlane.f32.xlu1 %v1952_v22 }
 0xe5f   :  { %1956 = vadd.xlane.f32.xlu1 %v1955_v42 }
 0xe6e   :  { %2964 = vrot.lane.b32.xlu0 %v2963_v5, %s3061_s11  ;;  %v1939_v5 = vmul.f32 %v4297_v8, %v4082_v58 }
 0xee4   :  { %v1817_v25 = vpop.xlane.xlu1 %1816 }
 0xee5   :  { %vm1819_vm11 = vcmp.gt.f32.partialorder %v1817_v25, 0.0  ;;  %v1814_v27 = vpop.xlane.xlu0 %1813 }
 0xee6   :  { %v1821_v33 = vsel %vm1819_vm11, %v1817_v25, 1.0  ;;  %vm1818_vm12 = vcmp.gt.f32.partialorder %v1814_v27, 0.0 }
 0xee7   :  { %3009 = vrcp.f32 %v1821_v33  ;;  %v1820_v51 = vsel %vm1818_vm12, %v1814_v27, 1.0 }
 0xee8   :  { %3011 = vrcp.f32 %v1820_v51  ;;  %v1954_v40 = vpop.xlane.xlu1 %1953 }
 0xee9   :  { %v2965_v41 = vpop.permute.xlu0 %2964  ;;  %v1958_v47 = vmul.f32 %v1954_v40, %v4162_v19 }
 0xeea   :  { %v2967_v24 = vunpack.i.h.bf16 %v2965_v41  ;;  %v2966_v57 = vunpack.i.l.bf16 %v2965_v41 }
 0xeec   :  { %v2928_v59 = vpack.c.bf16 %v2967_v24, %v2966_v57  ;;  %v1957_v45 = vpop.xlane.xlu1 %1956 }
 0xeed   :  { %v1959_v36 = vmul.f32 %v1957_v45, %v4167_v20 }
 0xeee   :  { %2930 = vmatprep.subr.msk.bf16.mxu0 %vm4133_vm3, %v2928_v59 }
 0xef1   :  { %v3010_v12 = vpop.eup %3009 }
 0xef2   :  { %v3012_v35 = vpop.eup %3011  ;;  %v1825_v11 = vmul.f32 %v3010_v12, %v1811_v49 }
 0xef3   :  { %v1823_v32 = vmul.f32 %v3012_v35, %v1810_v6 }
 0xef4   :  { %v1827_v49 = vmul.f32 %v1825_v11, %v4167_v20 }
 0xef5   :  { %2478 = vmatprep.mubr.msk.f32.mxu0 %vm1140_vm5, %v1823_v32  ;;  %v1826_v2 = vmul.f32 %v1823_v32, %v4162_v19 }
 0xef6   :  { %2479 = vmatmul.mubr.msk.f32.vlgmr.msra.gmra.mrb[28].mxu0 %vm1140_vm5, %v1825_v11  ;;  %v1831_v63 = vsel %vm1140_vm5, %v1827_v49, 0.0 }
 0xef7   :  { %2933 = vmatpush3.bf16.xpose.msk.msra.mxu0 %vm4133_vm3, %v2928_v59  ;;  %2485 = vmatprep.mubr.msk.f32.mxu0 %vm1036_vm2, %v1939_v5  ;;  %v1828_v26 = vsel %vm1140_vm5, %v1826_v2, 0.0  ;;  %vm2217_vm3 = vcmp.eq.s32.totalorder %v3561_v21, 1 }
 0xef8   :  { %1829 = vadd.xlane.f32.xlu0 %v1828_v26 }
 0xefe   :  { %2486 = vmatmul.mubr.msk.f32.vlgmr.msra.gmra.mrb[30].mxu0 %vm1036_vm2, %v1940_v30 }
 0xeff   :  { %2499 = vmatprep.mubr.msk.f32.mxu0 %vm3064_vm15, %v3060_v7 }
 0xf85   :  { %v1830_v59 = vpop.xlane.xlu0 %1829 }
 0xf86   :  { %v1927_v12 = vmul.f32 %v1830_v59, %v4295_v1 }
 0xfc9   :  { %v2480_v37 = vpop.f32.mrb[28].mxu0 }
 0xfca   :  { %v1916_v8 = vmul.f32 %v2480_v37, %v4076_v56  ;;  %v1906_v28 = vpop.f32.mrb[29].mxu0 }
 0xfcb   :  { %v1915_v57 = vmul.f32 %v1906_v28, %v4076_v56 }
 0xfcc   :  { %1921 = vrot.lane.b32.xlu0 %v1916_v8, %s3061_s11 }
 0xfd1   :  { %v2487_v52 = vpop.f32.mrb[30].mxu0 }
 0xfd2   :  { %v2048_v9 = vadd.f32 %v2487_v52, %v1959_v36  ;;  %v2042_v0 = vpop.f32.mrb[31].mxu0 }
 0xfd3   :  { %v2043_v17 = vadd.f32 %v2042_v0, %v1958_v47 }
 0xfd4   :  { %v2052_v53 = vmul.f32 0.17677669, %v2048_v9 }
 0xfd5   :  { %v2051_v34 = vmul.f32 0.17677669, %v2043_v17  ;;  %v3063_v17 = vmov 0.0|0.0  }
 0xfd6   :  { %v2054_v15 = vsel %vm70_vm4, %v2052_v53, -1e+30  ;;  %2938 = vmatprep.subr.bf16.mxu0 %v3063_v17 }
 0xfd7   :  { %v2053_v46 = vsel %vm69_vm6, %v2051_v34, -1e+30  ;;  %v2058_v23 = vsel %vm1140_vm5, %v2054_v15, -inf }
 0xfd8   :  { %v2055_v54 = vsel %vm1140_vm5, %v2053_v46, -inf }
 0xfd9   :  { %2056 = vmax.xlane.f32.xlu1 %v2055_v54 }
 0xfdd   :  { %2059 = vmax.xlane.f32.xlu1 %v2058_v23 }
0x103e   :  { %v1922_v28 = vpop.permute.xlu0 %1921 }
0x103f   :  { %v1926_v47 = vadd.f32 %v1922_v28, %v4310_v50  ;;  %v2208_v50 = vstv %s4470_s2 }
0x1066   :  { %v2057_v39 = vpop.xlane.xlu1 %2056 }
0x1067   :  { %v2061_v4 = vsub.f32 %v2053_v46, %v2057_v39  ;;  %v2219_v39 = vstv %s2218_s23 }
0x1069   :  { %v2063_v55 = vmul.f32 1.442695, %v2061_v4 }
0x106a   :  { %v2060_v60 = vpop.xlane.xlu1 %2059 }
0x106b   :  { %3013 = vpow2.f32 %v2063_v55  ;;  %v2062_v61 = vsub.f32 %v2054_v15, %v2060_v60 }
0x106d   :  { %v2065_v62 = vmul.f32 1.442695, %v2062_v61 }
0x106f   :  { %3015 = vpow2.f32 %v2065_v62 }
0x1075   :  { %v3014_v10 = vpop.eup %3013 }
0x1076   :  { %v2067_v16 = vsel %vm69_vm6, %v3014_v10, 0.0 }
0x1077   :  { %v2069_v38 = vsel %vm1140_vm5, %v2067_v16, 0.0 }
0x1078   :  { %2070 = vadd.xlane.f32.xlu1 %v2069_v38 }
0x1079   :  { %v3016_v44 = vpop.eup %3015 }
0x107a   :  { %v2068_v31 = vsel %vm70_vm4, %v3016_v44, 0.0 }
0x107b   :  { %v2072_v3 = vsel %vm1140_vm5, %v2068_v31, 0.0 }
0x107c   :  { %2073 = vadd.xlane.f32.xlu1 %v2072_v3 }
0x1080   :  { %1832 = vadd.xlane.f32.xlu1 %v1831_v63 }
0x1105   :  { %v2071_v6 = vpop.xlane.xlu1 %2070 }
0x1106   :  { %vm2075_vm13 = vcmp.gt.f32.partialorder %v2071_v6, 0.0 }
0x1107   :  { %v2077_v13 = vsel %vm2075_vm13, %v2071_v6, 1.0 }
0x1108   :  { %3017 = vrcp.f32 %v2077_v13 }
0x1109   :  { %v2074_v14 = vpop.xlane.xlu1 %2073 }
0x110a   :  { %vm2076_vm14 = vcmp.gt.f32.partialorder %v2074_v14, 0.0 }
0x110b   :  { %v2078_v22 = vsel %vm2076_vm14, %v2074_v14, 1.0 }
0x110c   :  { %3019 = vrcp.f32 %v2078_v22 }
0x1112   :  { %v3018_v43 = vpop.eup %3017 }
0x1113   :  { %v2080_v42 = vmul.f32 %v3018_v43, %v2067_v16 }
0x1115   :  { %2492 = vmatprep.mubr.msk.f32.mxu1 %vm1140_vm5, %v2080_v42  ;;  %v2083_v25 = vmul.f32 %v2080_v42, %v4162_v19  ;;  %v1833_v19 = vpop.xlane.xlu1 %1832 }
0x1116   :  { %v3020_v27 = vpop.eup %3019  ;;  %v1928_v35 = vmul.f32 %v1833_v19, %v4295_v1 }
0x1117   :  { %v2082_v33 = vmul.f32 %v3020_v27, %v2068_v31  ;;  %v2085_v51 = vsel %vm1140_vm5, %v2083_v25, 0.0 }
0x1118   :  { %2086 = vadd.xlane.f32.xlu1 %v2085_v51 }
0x1119   :  { %2493 = vmatmul.mubr.msk.f32.vlgmr.msra.gmra.mrb[18].mxu1 %vm1140_vm5, %v2082_v33  ;;  %v2084_v41 = vmul.f32 %v2082_v33, %v4167_v20 }
0x111b   :  { %v2088_v24 = vsel %vm1140_vm5, %v2084_v41, 0.0 }
0x111c   :  { %2089 = vadd.xlane.f32.xlu1 %v2088_v24 }
0x112d   :  { %1919 = vrot.lane.b32.xlu1 %v1915_v57, %s3061_s11 }
0x1131   :  { %1931 = vrot.lane.b32.xlu1 %v1927_v12, %s3061_s11 }
0x1135   :  { %1933 = vrot.lane.b32.xlu1 %v1928_v35, %s3061_s11 }
0x11a5   :  { %v2087_v32 = vpop.xlane.xlu1 %2086 }
0x11a6   :  { %v2184_v20 = vmul.f32 %v2087_v32, %v4344_v29 }
0x11a8   :  { %2188 = vrot.lane.b32.xlu1 %v2184_v20, %s3061_s11 }
0x11a9   :  { %v2090_v26 = vpop.xlane.xlu1 %2089 }
0x11aa   :  { %v2185_v1 = vmul.f32 %v2090_v26, %v4344_v29 }
0x11ad   :  { %v1920_v30 = vpop.permute.xlu1 %1919 }
0x11ae   :  { %v1925_v36 = vadd.f32 %v1920_v30, %v4308_v48  ;;  %v2199_v48 = vand.u32 127, %v161_v18 }
0x11b0   :  { %vm2209_vm1 = vcmp.eq.s32.totalorder %v2199_v48, %v2208_v50  ;;  %vm2220_vm4 = vcmp.eq.s32.totalorder %v2199_v48, %v2219_v39 }
0x11b1   :  { %v1932_v40 = vpop.permute.xlu1 %1931  ;;  %vm2210_vm2 = vmand %vm2207_vm0, %vm2209_vm1 }
0x11b2   :  { %v1937_v52 = vadd.f32 %v1932_v40, %v1925_v36  ;;  %v2211_v61 = vsel %vm2210_vm2, 1.0, %v3060_v7  ;;  %vm2221_vm6 = vmand %vm2217_vm3, %vm2220_vm4 }
0x11b3   :  { %v2222_v10 = vsel %vm2221_vm6, 1.0, %v2211_v61 }
0x11b5   :  { %v1934_v37 = vpop.permute.xlu1 %1933 }
0x11ec   :  { %v2494_v11 = vpop.f32.mrb[18].mxu1 }
0x11ed   :  { %v2173_v56 = vmul.f32 %v2494_v11, %v4082_v58  ;;  %v2163_v5 = vpop.f32.mrb[19].mxu1 }
0x11ee   :  { %v2172_v2 = vmul.f32 %v2163_v5, %v4082_v58  ;;  %v1938_v58 = vadd.f32 %v1934_v37, %v1926_v47 }
0x11ef   :  { %2178 = vrot.lane.b32.xlu1 %v2173_v56, %s3061_s11 }
0x11f3   :  { %2176 = vrot.lane.b32.xlu1 %v2172_v2, %s3061_s11 }
0x11f7   :  { %2190 = vrot.lane.b32.xlu1 %v2185_v1, %s3061_s11 }
0x121a   :  { %v2189_v8 = vpop.permute.xlu1 %2188 }
0x1261   :  { %v2179_v45 = vpop.permute.xlu1 %2178 }
0x1262   :  { %v2183_v53 = vadd.f32 %v2179_v45, %v1938_v58 }
0x1265   :  { %v2177_v9 = vpop.permute.xlu1 %2176 }
0x1266   :  { %v2182_v0 = vadd.f32 %v2177_v9, %v1937_v52 }
0x1268   :  { %v2194_v29 = vadd.f32 %v2189_v8, %v2182_v0 }
0x1269   :  { %v2191_v34 = vpop.permute.xlu1 %2190 }
0x126a   :  { %v2195_v46 = vadd.f32 %v2191_v34, %v2183_v53  ;;  %v2196_v54 = vmax.f32 %v2194_v29, 0.0 }
0x126c   :  { %v2197_v15 = vmax.f32 %v2195_v46, 0.0 }
0x126e   :  { %v2968_v23 = vpack.i.bf16 %v2197_v15, %v2196_v54 }
0x1270   :  { %2969 = vrot.lane.b32.xlu0 %v2968_v23, %s3061_s11  ;;  %s3065_s11 = smov [#allocation4]  }
0x1271   :  { %s2312_s24 = sshll.u32 %s3065_s11, 4  ;;  %s2313_s24 = int_to_ptr.vmem [resolvable:$true] %s2312_s24 }
0x1272   :  { %s3033_s25 = scalar_lea.vmem %s2313_s24, 32  ;;  %p3038_p10 = scmp.lt.s32.totalorder %s2313_s24, %s2313_s24 }
0x1273   :  { %p3034_p9 = scmp.ne.s32.totalorder %s2313_s24, %s3033_s25  ;;  %p3039_p11 = scmp.lt.s32.totalorder %s3033_s25, %s3033_s25 }
0x1275   :  { %p3040_p12 = por %p3039_p11, %p3038_p10 }
0x1277   :  { %p3041_p13 = pnand %p3040_p12, %p3034_p9 }
0x12e2   :  { %v2970_v4 = vpop.permute.xlu0 %2969 }
0x12e3   :  { %v2972_v55 = vunpack.i.h.bf16 %v2970_v4  ;;  %v2971_v60 = vunpack.i.l.bf16 %v2970_v4 }
0x12e5   :  { %v2939_v62 = vpack.c.bf16 %v2972_v55, %v2971_v60 }
0x12e7   :  { %2940 = vmatpush3.bf16.msra.mxu0 %v2939_v62 }
0x12ea   :  { %2500 = vmatmul.mubr.msk.f32.vlgmr.msra.gmra.mrb[32].mxu0 %vm1140_vm5, %v2222_v10 }
0x13bd   :  { %v2300_v18 = vpop.f32.mrb[32].mxu0 }
0x13be   :  { %2305 = vst.msk [vmem:[#allocation4] sm:$0x3] %vm2304_vm7, %v2300_v18  ;;  %v2501_v16 = vpop.f32.mrb[33].mxu0 }
0x13bf   :  { %3044 = shalt.err (!%p3041_p13)
}
0x13c0   :  { %s3045_s3 = scalar_lea.hbm %s4451_s19, 32 }
0x13c1   :  { %p3046_p0 = scmp.ne.s32.totalorder %s4451_s19, %s3045_s3  ;;  %p3049_p1 = scmp.lt.u32.totalorder %s3045_s3, %s4451_s19 }
0x13c3   :  { %p3051_p2 = pnand %p3049_p1, %p3046_p0 }
0x13c5   :  { %3054 = shalt.err (!%p3051_p2)
}
0x13c6   :  { %2315 = dma.vmem_to_hbm [thread:$0]  %s2313_s24, 32, %s4451_s19, [#allocation5]  }
0x13c7   :  { %3057 = dma.done.wait [#allocation5], 32  }
0x13c8   :  { %3058 = vsyncadd [#allocation5], 4294967264 }
0x13c9   :  { %2319 = vsyncpa [#allocation5], 1 }

</bundles_post_ra>
